<compile_context>
chip_gen: v6e
topology: v6e:2x2x1
jax: 0.10.0
libtpu: 0.0.40
codegen_flags: <defaults>
</compile_context>

<pallas_src>
import jax
import jax.numpy as jnp
from jax.experimental import pallas as pl
from jax.experimental.pallas import tpu as pltpu

STATE_DIM = 3
ACTION_DIM = 3
IN_DIM = STATE_DIM + ACTION_DIM          # 6
HIDDEN = (512, 512, 256, 128, 1)


def _critic_kernel(xu_ref,
                   w1_ref, b1_ref,
                   w2_ref, b2_ref,
                   w3_ref, b3_ref,
                   w4_ref, b4_ref,
                   w5_ref, b5_ref,
                   out_ref):
    # layer_1 + ReLU  (single contiguous [tile_b, 6] @ [6, 512] dot)
    h = (jnp.dot(xu_ref[...].astype(jnp.bfloat16), w1_ref[...],
                 preferred_element_type=jnp.float32) + b1_ref[...])
    h = jnp.maximum(h, 0.0).astype(jnp.bfloat16)

    # layer_2 + ReLU
    h = jnp.dot(h, w2_ref[...], preferred_element_type=jnp.float32) + b2_ref[...]
    h = jnp.maximum(h, 0.0).astype(jnp.bfloat16)

    # layer_3 + ReLU
    h = jnp.dot(h, w3_ref[...], preferred_element_type=jnp.float32) + b3_ref[...]
    h = jnp.maximum(h, 0.0).astype(jnp.bfloat16)

    # layer_4 + ReLU (keep f32 for the final VPU reduction)
    h = jnp.dot(h, w4_ref[...], preferred_element_type=jnp.float32) + b4_ref[...]
    h = jnp.maximum(h, 0.0)

    # layer_5 (out_features = 1): VPU multiply + lane reduction instead of an
    # MXU push with a single active output lane.  Result is stored lane-dense
    # as one (1, tile_b) row; b5 is a scalar in SMEM.
    w5 = w5_ref[...].astype(jnp.float32)              # (1, 128)
    q = jnp.sum(h * w5, axis=-1) + b5_ref[0]          # (tile_b,)
    out_ref[...] = q[None, :].astype(out_ref.dtype)   # lane-dense store


def _resident_spec(shape):
    """Full-array VMEM block, constant index_map, single-buffered.

    The block index never changes across grid steps, so it is DMA'd once and
    stays resident; Buffered(1) avoids allocating a useless second buffer."""
    nd = len(shape)
    return pl.BlockSpec(shape, lambda i, _nd=nd: (0,) * _nd,
                        memory_space=pltpu.MemorySpace.VMEM,
                        pipeline_mode=pl.Buffered(1))


def _choose_tile(batch, max_tile=None):
    """Batch tile: multiple of 128 (lane dim of the lane-dense output block),
    big enough to amortize per-step overhead, small enough to keep >=2 grid
    steps for v7x megacore whenever batch > 128."""
    if max_tile is None:
        max_tile = 1024 if batch >= 4096 else 512
    half = -(-batch // 2)                 # cdiv(batch, 2)
    half_up = -(-half // 128) * 128       # round up to a multiple of 128
    return max(128, min(max_tile, half_up))


def critic_forward(x, u, params, *, tile_b=None):
    """x: [B, state_dim] f32, u: [B, action_dim] f32.
    params: list of (W_bf16 (in, out), b_f32 (1, out)) from init_critic_params()."""
    B = x.shape[0]
    (w1, b1), (w2, b2), (w3, b3), (w4, b4), (w5, b5) = params

    if tile_b is None:
        tile_b = _choose_tile(B)
    num_tiles = pl.cdiv(B, tile_b)
    bp = num_tiles * tile_b

    # One contiguous [B, 6] layer-1 input; the concat costs B*24 bytes of HBM,
    # negligible next to the ~0.85 MB weight DMA, and buys one dot + no big
    # VPU add in the kernel.
    xu = jnp.concatenate([x.astype(jnp.float32), u.astype(jnp.float32)], axis=1)

    w5_row = w5.reshape(1, HIDDEN[3])            # (1, 128) bf16
    b5_s = b5.reshape(1).astype(jnp.float32)     # (1,) f32 scalar -> SMEM

    in_specs = [
        pl.BlockSpec((tile_b, IN_DIM), lambda i: (i, 0),
                     memory_space=pltpu.MemorySpace.VMEM),
        _resident_spec(w1.shape), _resident_spec(b1.shape),
        _resident_spec(w2.shape), _resident_spec(b2.shape),
        _resident_spec(w3.shape), _resident_spec(b3.shape),
        _resident_spec(w4.shape), _resident_spec(b4.shape),
        _resident_spec(w5_row.shape),
        pl.BlockSpec(memory_space=pltpu.MemorySpace.SMEM),   # b5 scalar
    ]
    # Lane-dense output: (1, bp) with batch on the lane axis.
    out_spec = pl.BlockSpec((1, tile_b), lambda i: (0, i),
                            memory_space=pltpu.MemorySpace.VMEM)
    out_shape = jax.ShapeDtypeStruct((1, bp), jnp.float32)

    out = pl.pallas_call(
        _critic_kernel,
        out_shape=out_shape,
        grid=(num_tiles,),
        in_specs=in_specs,
        out_specs=out_spec,
        compiler_params=pltpu.CompilerParams(
            dimension_semantics=("parallel",)),   # shard tiles over v7x's 2 TCs
    )(xu, w1, b1, w2, b2, w3, b3, w4, b4, w5_row, b5_s)

    # Drop the ragged-tile garbage lanes (>= B) and restore the (B, 1) shape.
    return out.reshape(bp)[:B].reshape(B, 1)


def init_critic_params(key, state_dim=STATE_DIM, action_dim=ACTION_DIM):
    """PyTorch nn.Linear-style init (uniform +-1/sqrt(fan_in)).
    Weights stored (in_features, out_features), cast once to bf16; biases f32."""
    dims = [state_dim + action_dim] + list(HIDDEN)
    params = []
    for i in range(len(dims) - 1):
        fan_in, fan_out = dims[i], dims[i + 1]
        key, kw, kb = jax.random.split(key, 3)
        bound = 1.0 / jnp.sqrt(jnp.float32(fan_in))
        w = jax.random.uniform(kw, (fan_in, fan_out), jnp.float32, -bound, bound)
        b = jax.random.uniform(kb, (1, fan_out), jnp.float32, -bound, bound)
        params.append((w.astype(jnp.bfloat16), b))
    return params


def critic_ref(x, u, params):
    """Pure-JAX reference mirroring the kernel's bf16-weight / f32-accumulate math."""
    h = jnp.concatenate([x, u], axis=1).astype(jnp.float32)
    n = len(params)
    for i, (w, b) in enumerate(params):
        lhs = h.astype(jnp.bfloat16) if i < n - 1 else h  # last layer runs in f32
        h = jnp.dot(lhs, w, preferred_element_type=jnp.float32) + b.astype(jnp.float32)
        if i < n - 1:
            h = jnp.maximum(h, 0.0)
    return h


if __name__ == "__main__":
    key = jax.random.PRNGKey(0)
    kp, kx, ku, kx2, ku2 = jax.random.split(key, 5)

    params = init_critic_params(kp)

    # Small batch (single grid step, ragged tile: block extends past B rows).
    B = 8
    x = jax.random.normal(kx, (B, STATE_DIM), jnp.float32)
    u = jax.random.normal(ku, (B, ACTION_DIM), jnp.float32)
    out = jax.block_until_ready(critic_forward(x, u, params))
    ref = critic_ref(x, u, params)
    assert out.shape == (B, 1), out.shape
    assert jnp.allclose(out, ref, atol=1e-2, rtol=1e-2), (
        float(jnp.max(jnp.abs(out - ref))))

    # Non-multiple-of-tile batch (multi-step grid + ragged last tile, 2 tiles
    # so both v7x TensorCores get work).
    B2 = 260
    x2 = jax.random.normal(kx2, (B2, STATE_DIM), jnp.float32)
    u2 = jax.random.normal(ku2, (B2, ACTION_DIM), jnp.float32)
    out2 = jax.block_until_ready(critic_forward(x2, u2, params))
    ref2 = critic_ref(x2, u2, params)
    assert out2.shape == (B2, 1), out2.shape
    assert jnp.allclose(out2, ref2, atol=1e-2, rtol=1e-2), (
        float(jnp.max(jnp.abs(out2 - ref2))))

    print("KERNEL_OK")
</pallas_src>

<mosaic_0001>
module attributes {stable_mosaic.version = 11 : i64} {
  func.func @_critic_kernel(%arg0: i32, %arg1: memref<128x6xf32, #tpu.memory_space<vmem>>, %arg2: memref<6x512xbf16, #tpu.memory_space<vmem>>, %arg3: memref<1x512xf32, #tpu.memory_space<vmem>>, %arg4: memref<512x512xbf16, #tpu.memory_space<vmem>>, %arg5: memref<1x512xf32, #tpu.memory_space<vmem>>, %arg6: memref<512x256xbf16, #tpu.memory_space<vmem>>, %arg7: memref<1x256xf32, #tpu.memory_space<vmem>>, %arg8: memref<256x128xbf16, #tpu.memory_space<vmem>>, %arg9: memref<1x128xf32, #tpu.memory_space<vmem>>, %arg10: memref<1x128xbf16, #tpu.memory_space<vmem>>, %arg11: memref<1xf32, #tpu.memory_space<smem>>, %arg12: memref<1x128xf32, #tpu.memory_space<vmem>>) attributes {dimension_semantics = [#tpu.dimension_semantics<parallel>], iteration_bounds = array<i64: 1>, scalar_prefetch = 0 : i64, scratch_operands = 0 : i64, tpu.core_type = #tpu.core_type<tc>, window_params = [{transform_indices = @transform_0, window_bounds = array<i64: 128, 6>}, {pipeline_mode = #tpu.pipeline_mode<synchronous>, transform_indices = @transform_1, window_bounds = array<i64: 6, 512>}, {pipeline_mode = #tpu.pipeline_mode<synchronous>, transform_indices = @transform_2, window_bounds = array<i64: 1, 512>}, {pipeline_mode = #tpu.pipeline_mode<synchronous>, transform_indices = @transform_3, window_bounds = array<i64: 512, 512>}, {pipeline_mode = #tpu.pipeline_mode<synchronous>, transform_indices = @transform_4, window_bounds = array<i64: 1, 512>}, {pipeline_mode = #tpu.pipeline_mode<synchronous>, transform_indices = @transform_5, window_bounds = array<i64: 512, 256>}, {pipeline_mode = #tpu.pipeline_mode<synchronous>, transform_indices = @transform_6, window_bounds = array<i64: 1, 256>}, {pipeline_mode = #tpu.pipeline_mode<synchronous>, transform_indices = @transform_7, window_bounds = array<i64: 256, 128>}, {pipeline_mode = #tpu.pipeline_mode<synchronous>, transform_indices = @transform_8, window_bounds = array<i64: 1, 128>}, {pipeline_mode = #tpu.pipeline_mode<synchronous>, transform_indices = @transform_9, window_bounds = array<i64: 1, 128>}, {transform_indices = @transform_10, window_bounds = array<i64: 1>}, {transform_indices = @transform_11, window_bounds = array<i64: 1, 128>}]} {
    %c0 = arith.constant 0 : index
    %c0_0 = arith.constant 0 : index
    %0 = vector.load %arg1[%c0, %c0_0] : memref<128x6xf32, #tpu.memory_space<vmem>>, vector<128x6xf32>
    %1 = arith.truncf %0 : vector<128x6xf32> to vector<128x6xbf16>
    %c0_1 = arith.constant 0 : index
    %c0_2 = arith.constant 0 : index
    %2 = vector.load %arg2[%c0_1, %c0_2] : memref<6x512xbf16, #tpu.memory_space<vmem>>, vector<6x512xbf16>
    %cst = arith.constant dense<0.000000e+00> : vector<128x512xf32>
    %3 = tpu.matmul %1, %2, %cst {dimension_numbers = #tpu.dot_dimension_numbers<[1], [0], [0], [1], [0, 0, 1, 1], [], []>} : vector<128x6xbf16>, vector<6x512xbf16>, vector<128x512xf32> -> vector<128x512xf32>
    %c0_3 = arith.constant 0 : index
    %c0_4 = arith.constant 0 : index
    %4 = vector.load %arg3[%c0_3, %c0_4] : memref<1x512xf32, #tpu.memory_space<vmem>>, vector<1x512xf32>
    %5 = vector.broadcast %4 : vector<1x512xf32> to vector<128x512xf32>
    %6 = arith.addf %3, %5 : vector<128x512xf32>
    %cst_5 = arith.constant 0.000000e+00 : f32
    %7 = vector.broadcast %cst_5 : f32 to vector<128x512xf32>
    %8 = arith.maximumf %6, %7 : vector<128x512xf32>
    %9 = arith.truncf %8 : vector<128x512xf32> to vector<128x512xbf16>
    %c0_6 = arith.constant 0 : index
    %c0_7 = arith.constant 0 : index
    %10 = vector.load %arg4[%c0_6, %c0_7] : memref<512x512xbf16, #tpu.memory_space<vmem>>, vector<512x512xbf16>
    %cst_8 = arith.constant dense<0.000000e+00> : vector<128x512xf32>
    %11 = tpu.matmul %9, %10, %cst_8 {dimension_numbers = #tpu.dot_dimension_numbers<[1], [0], [0], [1], [0, 0, 1, 1], [], []>} : vector<128x512xbf16>, vector<512x512xbf16>, vector<128x512xf32> -> vector<128x512xf32>
    %c0_9 = arith.constant 0 : index
    %c0_10 = arith.constant 0 : index
    %12 = vector.load %arg5[%c0_9, %c0_10] : memref<1x512xf32, #tpu.memory_space<vmem>>, vector<1x512xf32>
    %13 = vector.broadcast %12 : vector<1x512xf32> to vector<128x512xf32>
    %14 = arith.addf %11, %13 : vector<128x512xf32>
    %cst_11 = arith.constant 0.000000e+00 : f32
    %15 = vector.broadcast %cst_11 : f32 to vector<128x512xf32>
    %16 = arith.maximumf %14, %15 : vector<128x512xf32>
    %17 = arith.truncf %16 : vector<128x512xf32> to vector<128x512xbf16>
    %c0_12 = arith.constant 0 : index
    %c0_13 = arith.constant 0 : index
    %18 = vector.load %arg6[%c0_12, %c0_13] : memref<512x256xbf16, #tpu.memory_space<vmem>>, vector<512x256xbf16>
    %cst_14 = arith.constant dense<0.000000e+00> : vector<128x256xf32>
    %19 = tpu.matmul %17, %18, %cst_14 {dimension_numbers = #tpu.dot_dimension_numbers<[1], [0], [0], [1], [0, 0, 1, 1], [], []>} : vector<128x512xbf16>, vector<512x256xbf16>, vector<128x256xf32> -> vector<128x256xf32>
    %c0_15 = arith.constant 0 : index
    %c0_16 = arith.constant 0 : index
    %20 = vector.load %arg7[%c0_15, %c0_16] : memref<1x256xf32, #tpu.memory_space<vmem>>, vector<1x256xf32>
    %21 = vector.broadcast %20 : vector<1x256xf32> to vector<128x256xf32>
    %22 = arith.addf %19, %21 : vector<128x256xf32>
    %cst_17 = arith.constant 0.000000e+00 : f32
    %23 = vector.broadcast %cst_17 : f32 to vector<128x256xf32>
    %24 = arith.maximumf %22, %23 : vector<128x256xf32>
    %25 = arith.truncf %24 : vector<128x256xf32> to vector<128x256xbf16>
    %c0_18 = arith.constant 0 : index
    %c0_19 = arith.constant 0 : index
    %26 = vector.load %arg8[%c0_18, %c0_19] : memref<256x128xbf16, #tpu.memory_space<vmem>>, vector<256x128xbf16>
    %cst_20 = arith.constant dense<0.000000e+00> : vector<128x128xf32>
    %27 = tpu.matmul %25, %26, %cst_20 {dimension_numbers = #tpu.dot_dimension_numbers<[1], [0], [0], [1], [0, 0, 1, 1], [], []>} : vector<128x256xbf16>, vector<256x128xbf16>, vector<128x128xf32> -> vector<128x128xf32>
    %c0_21 = arith.constant 0 : index
    %c0_22 = arith.constant 0 : index
    %28 = vector.load %arg9[%c0_21, %c0_22] : memref<1x128xf32, #tpu.memory_space<vmem>>, vector<1x128xf32>
    %29 = vector.broadcast %28 : vector<1x128xf32> to vector<128x128xf32>
    %30 = arith.addf %27, %29 : vector<128x128xf32>
    %cst_23 = arith.constant 0.000000e+00 : f32
    %31 = vector.broadcast %cst_23 : f32 to vector<128x128xf32>
    %32 = arith.maximumf %30, %31 : vector<128x128xf32>
    %c0_24 = arith.constant 0 : index
    %c0_25 = arith.constant 0 : index
    %33 = vector.load %arg10[%c0_24, %c0_25] : memref<1x128xbf16, #tpu.memory_space<vmem>>, vector<1x128xbf16>
    %34 = arith.extf %33 : vector<1x128xbf16> to vector<1x128xf32>
    %35 = vector.broadcast %34 : vector<1x128xf32> to vector<128x128xf32>
    %36 = arith.mulf %32, %35 : vector<128x128xf32>
    %cst_26 = arith.constant dense<0.000000e+00> : vector<128xf32>
    %37 = vector.multi_reduction <add>, %36, %cst_26 [1] : vector<128x128xf32> to vector<128xf32>
    %c0_27 = arith.constant 0 : index
    %38 = memref.load %arg11[%c0_27] : memref<1xf32, #tpu.memory_space<smem>>
    %39 = vector.broadcast %38 : f32 to vector<128xf32>
    %40 = arith.addf %37, %39 : vector<128xf32>
    %41 = vector.shape_cast %40 : vector<128xf32> to vector<1x128xf32>
    %c0_28 = arith.constant 0 : index
    %c0_29 = arith.constant 0 : index
    %42 = vector.load %arg12[%c0_28, %c0_29] : memref<1x128xf32, #tpu.memory_space<vmem>>, vector<1x128xf32>
    tpu.vector_store %arg12[%c0_28, %c0_29], %41 {strides = array<i32>} : memref<1x128xf32, #tpu.memory_space<vmem>>, vector<1x128xf32>,
    return
  }
  func.func @transform_0(%arg0: i32) -> (i32, i32) {
    %c0_i32 = arith.constant 0 : i32
    %c0_i32_0 = arith.constant 0 : i32
    return %arg0, %c0_i32 : i32, i32
  }
  func.func @transform_1(%arg0: i32) -> (i32, i32) {
    %c0_i32 = arith.constant 0 : i32
    %c0_i32_0 = arith.constant 0 : i32
    %c0_i32_1 = arith.constant 0 : i32
    return %c0_i32, %c0_i32_0 : i32, i32
  }
  func.func @transform_2(%arg0: i32) -> (i32, i32) {
    %c0_i32 = arith.constant 0 : i32
    %c0_i32_0 = arith.constant 0 : i32
    %c0_i32_1 = arith.constant 0 : i32
    return %c0_i32, %c0_i32_0 : i32, i32
  }
  func.func @transform_3(%arg0: i32) -> (i32, i32) {
    %c0_i32 = arith.constant 0 : i32
    %c0_i32_0 = arith.constant 0 : i32
    %c0_i32_1 = arith.constant 0 : i32
    return %c0_i32, %c0_i32_0 : i32, i32
  }
  func.func @transform_4(%arg0: i32) -> (i32, i32) {
    %c0_i32 = arith.constant 0 : i32
    %c0_i32_0 = arith.constant 0 : i32
    %c0_i32_1 = arith.constant 0 : i32
    return %c0_i32, %c0_i32_0 : i32, i32
  }
  func.func @transform_5(%arg0: i32) -> (i32, i32) {
    %c0_i32 = arith.constant 0 : i32
    %c0_i32_0 = arith.constant 0 : i32
    %c0_i32_1 = arith.constant 0 : i32
    return %c0_i32, %c0_i32_0 : i32, i32
  }
  func.func @transform_6(%arg0: i32) -> (i32, i32) {
    %c0_i32 = arith.constant 0 : i32
    %c0_i32_0 = arith.constant 0 : i32
    %c0_i32_1 = arith.constant 0 : i32
    return %c0_i32, %c0_i32_0 : i32, i32
  }
  func.func @transform_7(%arg0: i32) -> (i32, i32) {
    %c0_i32 = arith.constant 0 : i32
    %c0_i32_0 = arith.constant 0 : i32
    %c0_i32_1 = arith.constant 0 : i32
    return %c0_i32, %c0_i32_0 : i32, i32
  }
  func.func @transform_8(%arg0: i32) -> (i32, i32) {
    %c0_i32 = arith.constant 0 : i32
    %c0_i32_0 = arith.constant 0 : i32
    %c0_i32_1 = arith.constant 0 : i32
    return %c0_i32, %c0_i32_0 : i32, i32
  }
  func.func @transform_9(%arg0: i32) -> (i32, i32) {
    %c0_i32 = arith.constant 0 : i32
    %c0_i32_0 = arith.constant 0 : i32
    %c0_i32_1 = arith.constant 0 : i32
    return %c0_i32, %c0_i32_0 : i32, i32
  }
  func.func @transform_10(%arg0: i32) -> i32 {
    %c0_i32 = arith.constant 0 : i32
    %c0_i32_0 = arith.constant 0 : i32
    return %c0_i32 : i32
  }
  func.func @transform_11(%arg0: i32) -> (i32, i32) {
    %c0_i32 = arith.constant 0 : i32
    %c0_i32_0 = arith.constant 0 : i32
    return %c0_i32, %arg0 : i32, i32
  }
}

</mosaic_0001>

<bundles_post_ra>
// kernel: tpu_custom_call.1
= control target key start
LH: loop header
LB: loop body
LE: loop exit
PB: predicated region body
PF: predicated region fallthrough
CT: control target
= control target key end

     0   :  { %17 = vsyncpa [#allocation4], 0  ;;  %s4367_s0 = inlined_call_operand.hbm [shape: f32[8,6], index: 0, kind: input, shape index: {}]   ;;  %s4368_s1 = inlined_call_operand.hbm [shape: bf16[6,512], index: 1, kind: input, shape index: {}]   ;;  %s4369_s2 = inlined_call_operand.vmem [shape: f32[1,512], index: 2, kind: input, shape index: {}]   ;;  %s4370_s3 = inlined_call_operand.hbm [shape: bf16[512,512], index: 3, kind: input, shape index: {}]   ;;  %s4371_s4 = inlined_call_operand.vmem [shape: f32[1,512], index: 4, kind: input, shape index: {}]   ;;  %s4372_s5 = inlined_call_operand.hbm [shape: bf16[512,256], index: 5, kind: input, shape index: {}]   ;;  %s4373_s6 = inlined_call_operand.vmem [shape: f32[1,256], index: 6, kind: input, shape index: {}]   ;;  %s4374_s7 = inlined_call_operand.hbm [shape: bf16[256,128], index: 7, kind: input, shape index: {}]   ;;  %s4375_s8 = inlined_call_operand.vmem [shape: f32[1,128], index: 8, kind: input, shape index: {}]   ;;  %s4376_s9 = inlined_call_operand.vmem [shape: bf16[1,128], index: 9, kind: input, shape index: {}]   ;;  %s4377_s10 = inlined_call_operand.<no memory space> [shape: f32[1], index: 10, kind: input, shape index: {}]   ;;  %s4378_s11 = inlined_call_operand.hbm [shape: f32[1,128], index: 11, kind: output, shape index: {}]  }
   0x1   :  { %18 = vsyncpa [#allocation7], 0 }
   0x2   :  { %19 = vsyncpa [#allocation10], 0 }
   0x3   :  { %20 = vsyncpa [#allocation5], 0 }
   0x4   :  { %25 = vsyncadd [#allocation4], 1920  ;;  %s3759_s17 = smov [#allocation6]  }
   0x5   :  { %s39_s18 = sshll.u32 %s3759_s17, 4  ;;  %s40_s18 = int_to_ptr.vmem [resolvable:$true] %s39_s18 }
   0x6   :  { %s3639_s19 = scalar_lea.vmem %s40_s18, 256  ;;  %p3644_p1 = scmp.lt.s32.totalorder %s40_s18, %s40_s18 }
   0x7   :  { %p3640_p0 = scmp.ne.s32.totalorder %s40_s18, %s3639_s19  ;;  %p3645_p2 = scmp.lt.s32.totalorder %s3639_s19, %s3639_s19 }
   0x9   :  { %p3646_p3 = por %p3645_p2, %p3644_p1 }
   0xb   :  { %p3647_p4 = pnand %p3646_p3, %p3640_p0 }
   0xd   :  { %3650 = shalt.err (!%p3647_p4)
}
   0xe   :  { %42 = dma.hbm_to_vmem [thread:$0]  %s4368_s1, 256, %s40_s18, [#allocation7]  }
   0xf   :  { %s3760_s22 = smov [#allocation9]   ;;  %s3761_s24 = smov [#allocation3]  }
  0x10   :  { %s64_s23 = sshll.u32 %s3760_s22, 4  ;;  %s26_s25 = sshll.u32 %s3761_s24, 4  ;;  %s65_s23 = int_to_ptr.vmem [resolvable:$true] %s64_s23  ;;  %s27_s25 = int_to_ptr.vmem [resolvable:$true] %s26_s25 }
  0x11   :  { %s3659_s26 = scalar_lea.vmem %s65_s23, 8192  ;;  %p3664_p6 = scmp.lt.s32.totalorder %s65_s23, %s65_s23 }
  0x12   :  { %p3660_p5 = scmp.ne.s32.totalorder %s65_s23, %s3659_s26  ;;  %p3665_p7 = scmp.lt.s32.totalorder %s3659_s26, %s3659_s26 }
  0x14   :  { %p3666_p8 = por %p3665_p7, %p3664_p6 }
  0x16   :  { %p3667_p9 = pnand %p3666_p8, %p3660_p5 }
  0x18   :  { %3670 = shalt.err (!%p3667_p9)
}
  0x19   :  { %s3762_s27 = smov 128   ;;  %s3763_s28 = smov 8  }
  0x1a   :  { %70 = dma.hbm_to_vmem [thread:$0]  %s4372_s5, 8192, %s65_s23, [#allocation10], %s3762_s27, %s3762_s27, %s3763_s28  }
  0x1b   :  { %s3679_s1 = scalar_lea.vmem %s27_s25, 128  ;;  %s3683_s12 = scalar_lea.vmem %s27_s25, 2048 }
  0x1c   :  { %p3680_p10 = scmp.ne.s32.totalorder %s27_s25, %s3679_s1  ;;  %p3684_p11 = scmp.lt.s32.totalorder %s27_s25, %s27_s25 }
  0x1d   :  { %p3685_p12 = scmp.lt.s32.totalorder %s3683_s12, %s3679_s1 }
  0x1f   :  { %p3686_p13 = por %p3685_p12, %p3684_p11 }
  0x21   :  { %p3687_p0 = pnand %p3686_p13, %p3680_p10 }
  0x23   :  { %3690 = shalt.err (!%p3687_p0)
}
  0x24   :  { %32 = dma.hbm_to_vmem [thread:$0]  %s4367_s0, 128, %s27_s25, [#allocation4], %s3762_s27, %s3762_s27, %s3763_s28  }
  0x25   :  { %s3764_s15 = smov [#allocation8]  }
  0x26   :  { %s50_s16 = sshll.u32 %s3764_s15, 4  ;;  %s51_s16 = int_to_ptr.vmem [resolvable:$true] %s50_s16 }
  0x27   :  { %s3699_s17 = scalar_lea.vmem %s51_s16, 16384  ;;  %p3704_p2 = scmp.lt.s32.totalorder %s51_s16, %s51_s16 }
  0x28   :  { %p3700_p1 = scmp.ne.s32.totalorder %s51_s16, %s3699_s17  ;;  %p3705_p3 = scmp.lt.s32.totalorder %s3699_s17, %s3699_s17 }
  0x2a   :  { %p3706_p4 = por %p3705_p3, %p3704_p2 }
  0x2c   :  { %p3707_p5 = pnand %p3706_p4, %p3700_p1 }
  0x2e   :  { %3710 = shalt.err (!%p3707_p5)
}
  0x2f   :  { %s3765_s5 = smov 256   ;;  %s3766_s18 = smov 16  }
  0x30   :  { %56 = dma.hbm_to_vmem [thread:$0]  %s4370_s3, 16384, %s51_s16, [#allocation7], %s3765_s5, %s3765_s5, %s3766_s18  }
  0x31   :  { %s3767_s21 = smov [#allocation11]  }
  0x32   :  { %s78_s22 = sshll.u32 %s3767_s21, 4  ;;  %s79_s22 = int_to_ptr.vmem [resolvable:$true] %s78_s22 }
  0x33   :  { %s3719_s0 = scalar_lea.vmem %s79_s22, 2048  ;;  %p3724_p7 = scmp.lt.s32.totalorder %s79_s22, %s79_s22 }
  0x34   :  { %p3720_p6 = scmp.ne.s32.totalorder %s79_s22, %s3719_s0  ;;  %p3725_p8 = scmp.lt.s32.totalorder %s3719_s0, %s3719_s0 }
  0x36   :  { %p3726_p9 = por %p3725_p8, %p3724_p7 }
  0x38   :  { %p3727_p10 = pnand %p3726_p9, %p3720_p6 }
  0x3a   :  { %3730 = shalt.err (!%p3727_p10)
}
  0x3b   :  { %s3768_s23 = smov 64   ;;  %s3769_s24 = smov 4  }
  0x3c   :  { %84 = dma.hbm_to_vmem [thread:$0]  %s4374_s7, 2048, %s79_s22, [#allocation10], %s3768_s23, %s3768_s23, %s3769_s24  }
  0x3d   :  { %3751 = dma.done.wait [#allocation4], 2048  }
  0x3e   :  { %3752 = vsyncadd [#allocation4], 4294965248 }
  0x3f   :  { %3753 = dma.done.wait [#allocation7], 16640  }
  0x40   :  { %3754 = vsyncadd [#allocation7], 4294950656 }
  0x41   :  { %3755 = dma.done.wait [#allocation10], 10240  }
  0x42   :  { %3756 = vsyncadd [#allocation10], 4294957056  ;;  %v3770_v0 = vmov 0   ;;  %v131_v1 = vld [vmem:[#allocation6] sm:$0x77]  ;;  %vm190_vm0 = vcmask 1042432  }
  0x43   :  { %235 = vmatprep.mubr.bf16.mxu0 %v3770_v0  ;;  %348 = vmatprep.mubr.bf16.mxu1 %v3770_v0  ;;  %v132_v2 = vld [vmem:[#allocation6 + $0x8] sm:$0x77]  ;;  %v107_v3 = vld [vmem:[#allocation3] sm:$0xff]  ;;  %v3000_v4 = vcombine.high %v131_v1, %v131_v1  ;;  %v2999_v6 = vcombine.low %v131_v1, %v131_v1  ;;  %vm165_vm1 = vcmask 48128   ;;  %v109_v12 = vld [vmem:[#allocation3 + $0x10] sm:$0xff]  ;;  %vm2880_vm2 = vcmask 130112  }
  0x44   :  { %v3002_v5 = vcombine.high %v132_v2, %v132_v2  ;;  %v3001_v7 = vcombine.low %v132_v2, %v132_v2  ;;  %v108_v8 = vld [vmem:[#allocation3 + $0x8] sm:$0xff]  ;;  %v110_v13 = vld [vmem:[#allocation3 + $0x18] sm:$0xff]  ;;  %v3327_v14 = vld [vmem:[#allocation8 + $0xe0] ss:$16 sps:$4 sm:$0xff]   ;;  %vm2887_vm3 = vcmask 195712   ;;  %vm2894_vm4 = vcmask 261312  }
  0x45   :  { %3003 = vmatprep.subr.msk.bf16.mxu0 %vm190_vm0, %v3000_v4  ;;  %v192_v9 = vsel %vm190_vm0, %v2999_v6, 0  ;;  %v123_v11 = vpack.c.bf16 %v108_v8, %v107_v3  ;;  %v3329_v15 = vld [vmem:[#allocation8 + $0xe4] ss:$16 sps:$4 sm:$0xff]   ;;  %v3330_v16 = vld [vmem:[#allocation8 + $0x2e0] ss:$16 sps:$4 sm:$0xff]   ;;  %v124_v20 = vpack.c.bf16 %v110_v13, %v109_v12  ;;  %v112_v28 = vld [vmem:[#allocation3 + $0x28] sm:$0xff] }
  0x46   :  { %3012 = vmatprep.subr.msk.bf16.mxu1 %vm190_vm0, %v3002_v5  ;;  %v198_v10 = vsel %vm190_vm0, %v3001_v7, 0  ;;  %218 = vmatpush1.bf16.msra.mxu0 %v192_v9  ;;  %v3332_v17 = vld [vmem:[#allocation8 + $0x2e4] ss:$16 sps:$4 sm:$0xff]   ;;  %v3333_v19 = vld [vmem:[#allocation8 + $0xc0] ss:$16 sps:$4 sm:$0xff]   ;;  %v114_v39 = vld [vmem:[#allocation3 + $0x38] sm:$0xff] }
  0x47   :  { %331 = vmatpush1.bf16.msra.mxu1 %v198_v10  ;;  %1315 = vmatprep.subr.bf16.mxu0 %v3329_v15  ;;  %v3335_v18 = vld [vmem:[#allocation8 + $0xc4] ss:$16 sps:$4 sm:$0xff]   ;;  %v3336_v22 = vld [vmem:[#allocation8 + $0x2c0] ss:$16 sps:$4 sm:$0xff]   ;;  %v116_v50 = vld [vmem:[#allocation3 + $0x48] sm:$0xff]  ;;  %vm2901_vm5 = vcmask 326912  }
  0x48   :  { %1428 = vmatprep.subr.bf16.mxu1 %v3332_v17  ;;  %v3338_v21 = vld [vmem:[#allocation8 + $0x2c4] ss:$16 sps:$4 sm:$0xff]   ;;  %v3339_v23 = vld [vmem:[#allocation8 + $0xa0] ss:$16 sps:$4 sm:$0xff]   ;;  %v118_v59 = vld [vmem:[#allocation3 + $0x58] sm:$0xff]  ;;  %vm2908_vm6 = vcmask 392512  }
  0x49   :  { %3004 = vmatmul.mubr.msk.bf16.vlgmr.msra.gmra.mxu0 %vm165_vm1, %v123_v11  ;;  %v3341_v24 = vld [vmem:[#allocation8 + $0xa4] ss:$16 sps:$4 sm:$0xff]   ;;  %v3342_v29 = vld [vmem:[#allocation8 + $0x2a0] ss:$16 sps:$4 sm:$0xff]   ;;  %v120_v9 = vld [vmem:[#allocation3 + $0x68] sm:$0xff]  ;;  %vm2915_vm7 = vcmask 458112  }
  0x4a   :  { %3013 = vmatmul.mubr.msk.bf16.vlgmr.msra.gmra.mxu1 %vm165_vm1, %v123_v11  ;;  %245 = vmatprep.mubr.bf16.mxu0 %v3770_v0  ;;  %v3344_v25 = vld [vmem:[#allocation8 + $0x2a4] ss:$16 sps:$4 sm:$0xff]   ;;  %v3345_v30 = vld [vmem:[#allocation8 + $0x80] ss:$16 sps:$4 sm:$0xff]   ;;  %vm2922_vm8 = vcmask 523712   ;;  %vm2929_vm9 = vcmask 589312  }
  0x4b   :  { %358 = vmatprep.mubr.bf16.mxu1 %v3770_v0  ;;  %1316 = vmatpush1.bf16.msra.mxu0 %v3327_v14  ;;  %v3347_v26 = vld [vmem:[#allocation8 + $0x84] ss:$16 sps:$4 sm:$0xff]   ;;  %v3348_v33 = vld [vmem:[#allocation8 + $0x280] ss:$16 sps:$4 sm:$0xff]   ;;  %vm2936_vm10 = vcmask 654912   ;;  %vm2943_vm11 = vcmask 720512  }
  0x4c   :  { %1429 = vmatpush1.bf16.msra.mxu1 %v3330_v16  ;;  %1317 = vmatprep.subr.bf16.mxu0 %v3335_v18  ;;  %v111_v27 = vld [vmem:[#allocation3 + $0x20] sm:$0xff]  ;;  %v113_v38 = vld [vmem:[#allocation3 + $0x30] sm:$0xff]  ;;  %vm2950_vm12 = vcmask 786112   ;;  %vm2957_vm13 = vcmask 851712   ;;  %vm2964_vm14 = vcmask 917312   ;;  %vm2971_vm15 = vcmask 982912  }
  0x4d   :  { %1430 = vmatprep.subr.bf16.mxu1 %v3338_v21  ;;  %v3350_v31 = vld [vmem:[#allocation8 + $0x284] ss:$16 sps:$4 sm:$0xff]   ;;  %v125_v32 = vpack.c.bf16 %v112_v28, %v111_v27  ;;  %v3351_v34 = vld [vmem:[#allocation8 + $0x60] ss:$16 sps:$4 sm:$0xff]   ;;  %v126_v43 = vpack.c.bf16 %v114_v39, %v113_v38  ;;  %vm2978_vm0 = vcmask 1048512  }
  0x4e   :  { %v3353_v35 = vld [vmem:[#allocation8 + $0x64] ss:$16 sps:$4 sm:$0xff]   ;;  %v3354_v40 = vld [vmem:[#allocation8 + $0x260] ss:$16 sps:$4 sm:$0xff]  }
  0x4f   :  { %1318 = vmatpush1.bf16.msra.mxu0 %v3333_v19  ;;  %v3356_v36 = vld [vmem:[#allocation8 + $0x264] ss:$16 sps:$4 sm:$0xff]   ;;  %v3357_v41 = vld [vmem:[#allocation8 + $0x40] ss:$16 sps:$4 sm:$0xff]   ;;  %v122_v19 = vld [vmem:[#allocation3 + $0x78] sm:$0xff] }
  0x50   :  { %1431 = vmatpush1.bf16.msra.mxu1 %v3336_v22  ;;  %1319 = vmatprep.subr.bf16.mxu0 %v3341_v24  ;;  %v3359_v37 = vld [vmem:[#allocation8 + $0x44] ss:$16 sps:$4 sm:$0xff]   ;;  %v3360_v44 = vld [vmem:[#allocation8 + $0x240] ss:$16 sps:$4 sm:$0xff]  }
  0x51   :  { %3005 = vmatmul.mubr.msk.bf16.gmra.mxu0 %vm165_vm1, %v124_v20  ;;  %1432 = vmatprep.subr.bf16.mxu1 %v3344_v25  ;;  %v3362_v42 = vld [vmem:[#allocation8 + $0x244] ss:$16 sps:$4 sm:$0xff]   ;;  %v3363_v45 = vld [vmem:[#allocation8 + $0x20] ss:$16 sps:$4 sm:$0xff]  }
  0x52   :  { %3014 = vmatmul.mubr.msk.bf16.gmra.mxu1 %vm165_vm1, %v124_v20  ;;  %255 = vmatprep.mubr.bf16.mxu0 %v3770_v0  ;;  %v3365_v46 = vld [vmem:[#allocation8 + $0x24] ss:$16 sps:$4 sm:$0xff]   ;;  %v3366_v51 = vld [vmem:[#allocation8 + $0x220] ss:$16 sps:$4 sm:$0xff]  }
  0x53   :  { %368 = vmatprep.mubr.bf16.mxu1 %v3770_v0  ;;  %1320 = vmatpush1.bf16.msra.mxu0 %v3339_v23  ;;  %v3368_v47 = vld [vmem:[#allocation8 + $0x224] ss:$16 sps:$4 sm:$0xff]   ;;  %v3369_v52 = vld [vmem:[#allocation8] ss:$16 sps:$4 sm:$0xff]  }
  0x54   :  { %1321 = vmatprep.subr.bf16.mxu0 %v3347_v26  ;;  %1433 = vmatpush1.bf16.msra.mxu1 %v3342_v29  ;;  %v3371_v48 = vld [vmem:[#allocation8 + $0x4] ss:$16 sps:$4 sm:$0xff]   ;;  %v3372_v55 = vld [vmem:[#allocation8 + $0x200] ss:$16 sps:$4 sm:$0xff]  }
  0x55   :  { %1434 = vmatprep.subr.bf16.mxu1 %v3350_v31  ;;  %v115_v49 = vld [vmem:[#allocation3 + $0x40] sm:$0xff]  ;;  %v117_v58 = vld [vmem:[#allocation3 + $0x50] sm:$0xff] }
  0x56   :  { %v3374_v53 = vld [vmem:[#allocation8 + $0x204] ss:$16 sps:$4 sm:$0xff]   ;;  %v127_v54 = vpack.c.bf16 %v116_v50, %v115_v49  ;;  %v3375_v56 = vld [vmem:[#allocation8 + $0x1e0] ss:$16 sps:$4 sm:$0xff]   ;;  %v128_v2 = vpack.c.bf16 %v118_v59, %v117_v58 }
  0x57   :  { %1322 = vmatpush1.bf16.msra.mxu0 %v3345_v30  ;;  %v3377_v57 = vld [vmem:[#allocation8 + $0x1e4] ss:$16 sps:$4 sm:$0xff]   ;;  %v3378_v62 = vld [vmem:[#allocation8 + $0x3e0] ss:$16 sps:$4 sm:$0xff]  }
  0x58   :  { %1435 = vmatpush1.bf16.msra.mxu1 %v3348_v33  ;;  %1323 = vmatprep.subr.bf16.mxu0 %v3353_v35  ;;  %v3380_v60 = vld [vmem:[#allocation8 + $0x3e4] ss:$16 sps:$4 sm:$0xff]   ;;  %v3381_v63 = vld [vmem:[#allocation8 + $0x1c0] ss:$16 sps:$4 sm:$0xff]   ;;  %v3425_v33 = vld [vmem:[#allocation8 + $0xec] ss:$16 sps:$4 sm:$0xff]   ;;  %v135_v35 = vlaneseq }
  0x59   :  { %3006 = vmatmul.mubr.msk.bf16.gmra.mxu0 %vm165_vm1, %v125_v32  ;;  %1436 = vmatprep.subr.bf16.mxu1 %v3356_v36  ;;  %v3383_v61 = vld [vmem:[#allocation8 + $0x1c4] ss:$16 sps:$4 sm:$0xff]   ;;  %v3384_v3 = vld [vmem:[#allocation8 + $0x3c0] ss:$16 sps:$4 sm:$0xff]  }
  0x5a   :  { %3015 = vmatmul.mubr.msk.bf16.gmra.mxu1 %vm165_vm1, %v125_v32  ;;  %265 = vmatprep.mubr.bf16.mxu0 %v3770_v0  ;;  %v3386_v1 = vld [vmem:[#allocation8 + $0x3c4] ss:$16 sps:$4 sm:$0xff]   ;;  %v3387_v5 = vld [vmem:[#allocation8 + $0x1a0] ss:$16 sps:$4 sm:$0xff]   ;;  %v3880_v36 = vshrl.u32 %v135_v35, 7 }
  0x5b   :  { %378 = vmatprep.mubr.bf16.mxu1 %v3770_v0  ;;  %1324 = vmatpush1.bf16.msra.mxu0 %v3351_v34  ;;  %v3389_v4 = vld [vmem:[#allocation8 + $0x1a4] ss:$16 sps:$4 sm:$0xff]   ;;  %v3390_v10 = vld [vmem:[#allocation8 + $0x3a0] ss:$16 sps:$4 sm:$0xff]   ;;  %v3428_v34 = vld [vmem:[#allocation8 + $0x2ec] ss:$16 sps:$4 sm:$0xff]  }
  0x5c   :  { %1325 = vmatprep.subr.bf16.mxu0 %v3359_v37  ;;  %1437 = vmatpush1.bf16.msra.mxu1 %v3354_v40  ;;  %v3392_v6 = vld [vmem:[#allocation8 + $0x3a4] ss:$16 sps:$4 sm:$0xff]   ;;  %v3393_v11 = vld [vmem:[#allocation8 + $0x180] ss:$16 sps:$4 sm:$0xff]   ;;  %v3883_v37 = vsub.s32 1, %v3880_v36  ;;  %v149_v38 = vsub.s32 3, %v3880_v36 }
  0x5d   :  { %1438 = vmatprep.subr.bf16.mxu1 %v3362_v42  ;;  %v3395_v7 = vld [vmem:[#allocation8 + $0x184] ss:$16 sps:$4 sm:$0xff]   ;;  %v3396_v14 = vld [vmem:[#allocation8 + $0x380] ss:$16 sps:$4 sm:$0xff]   ;;  %v3887_v39 = vsub.s32 0, %v3880_v36  ;;  %v145_v40 = vsub.s32 2, %v3880_v36 }
  0x5e   :  { %v119_v8 = vld [vmem:[#allocation3 + $0x60] sm:$0xff]  ;;  %v121_v18 = vld [vmem:[#allocation3 + $0x70] sm:$0xff] }
  0x5f   :  { %1326 = vmatpush1.bf16.msra.mxu0 %v3357_v41  ;;  %v3398_v12 = vld [vmem:[#allocation8 + $0x384] ss:$16 sps:$4 sm:$0xff]   ;;  %v129_v13 = vpack.c.bf16 %v120_v9, %v119_v8  ;;  %v3399_v16 = vld [vmem:[#allocation8 + $0x160] ss:$16 sps:$4 sm:$0xff]   ;;  %v130_v21 = vpack.c.bf16 %v122_v19, %v121_v18  ;;  %v3431_v19 = vld [vmem:[#allocation8 + $0xcc] ss:$16 sps:$4 sm:$0xff]  }
  0x60   :  { %1439 = vmatpush1.bf16.msra.mxu1 %v3360_v44  ;;  %1327 = vmatprep.subr.bf16.mxu0 %v3365_v46  ;;  %v3401_v15 = vld [vmem:[#allocation8 + $0x164] ss:$16 sps:$4 sm:$0xff]   ;;  %v3402_v20 = vld [vmem:[#allocation8 + $0x360] ss:$16 sps:$4 sm:$0xff]  }
  0x61   :  { %3007 = vmatmul.mubr.msk.bf16.gmra.mxu0 %vm165_vm1, %v126_v43  ;;  %1440 = vmatprep.subr.bf16.mxu1 %v3368_v47  ;;  %v3404_v17 = vld [vmem:[#allocation8 + $0x364] ss:$16 sps:$4 sm:$0xff]   ;;  %v3405_v24 = vld [vmem:[#allocation8 + $0x140] ss:$16 sps:$4 sm:$0xff]  }
  0x62   :  { %3016 = vmatmul.mubr.msk.bf16.gmra.mxu1 %vm165_vm1, %v126_v43  ;;  %275 = vmatprep.mubr.bf16.mxu0 %v3770_v0  ;;  %v3407_v22 = vld [vmem:[#allocation8 + $0x144] ss:$16 sps:$4 sm:$0xff]   ;;  %v3408_v25 = vld [vmem:[#allocation8 + $0x340] ss:$16 sps:$4 sm:$0xff]  }
  0x63   :  { %388 = vmatprep.mubr.bf16.mxu1 %v3770_v0  ;;  %1328 = vmatpush1.bf16.msra.mxu0 %v3363_v45  ;;  %v3410_v23 = vld [vmem:[#allocation8 + $0x344] ss:$16 sps:$4 sm:$0xff]   ;;  %v3411_v27 = vld [vmem:[#allocation8 + $0x120] ss:$16 sps:$4 sm:$0xff]  }
  0x64   :  { %1329 = vmatprep.subr.bf16.mxu0 %v3371_v48  ;;  %1441 = vmatpush1.bf16.msra.mxu1 %v3366_v51  ;;  %v3413_v26 = vld [vmem:[#allocation8 + $0x124] ss:$16 sps:$4 sm:$0xff]   ;;  %v3414_v28 = vld [vmem:[#allocation8 + $0x320] ss:$16 sps:$4 sm:$0xff]  }
  0x65   :  { %1442 = vmatprep.subr.bf16.mxu1 %v3374_v53  ;;  %v3419_v29 = vld [vmem:[#allocation8 + $0x104] ss:$16 sps:$4 sm:$0xff]   ;;  %v3417_v31 = vld [vmem:[#allocation8 + $0x100] ss:$16 sps:$4 sm:$0xff]  }
  0x66   :  { %v3422_v30 = vld [vmem:[#allocation8 + $0x304] ss:$16 sps:$4 sm:$0xff]   ;;  %v3420_v32 = vld [vmem:[#allocation8 + $0x300] ss:$16 sps:$4 sm:$0xff]  }
  0x67   :  { %1330 = vmatpush1.bf16.msra.mxu0 %v3369_v52  ;;  %v133_v41 = vld [vmem:[%s4369_s2] sm:$0xf] }
  0x68   :  { %1443 = vmatpush1.bf16.msra.mxu1 %v3372_v55  ;;  %1331 = vmatprep.subr.bf16.mxu0 %v3377_v57  ;;  %v3894_v44 = vrot.slane %v133_v41, %v3883_v37  ;;  %v3898_v45 = vrot.slane %v133_v41, %v149_v38  ;;  %v3901_v46 = vrot.slane %v133_v41, %v3887_v39 }
  0x69   :  { %3008 = vmatmul.mubr.msk.bf16.gmra.mxu0 %vm165_vm1, %v127_v54  ;;  %1444 = vmatprep.subr.bf16.mxu1 %v3380_v60  ;;  %v3905_v47 = vrot.slane %v133_v41, %v145_v40 }
  0x6a   :  { %3017 = vmatmul.mubr.msk.bf16.gmra.mxu1 %vm165_vm1, %v127_v54  ;;  %285 = vmatprep.mubr.bf16.mxu0 %v3770_v0 }
  0x6b   :  { %398 = vmatprep.mubr.bf16.mxu1 %v3770_v0  ;;  %1332 = vmatpush2.bf16.msra.mxu0 %v3375_v56 }
  0x6c   :  { %1333 = vmatprep.subr.bf16.mxu0 %v3383_v61  ;;  %1445 = vmatpush2.bf16.msra.mxu1 %v3378_v62 }
  0x6d   :  { %1446 = vmatprep.subr.bf16.mxu1 %v3386_v1 }
  0x6f   :  { %1334 = vmatpush2.bf16.msra.mxu0 %v3381_v63 }
  0x70   :  { %1447 = vmatpush2.bf16.msra.mxu1 %v3384_v3  ;;  %1335 = vmatprep.subr.bf16.mxu0 %v3389_v4 }
  0x71   :  { %3009 = vmatmul.mubr.msk.bf16.gmra.mxu0 %vm165_vm1, %v128_v2  ;;  %1448 = vmatprep.subr.bf16.mxu1 %v3392_v6 }
  0x72   :  { %3018 = vmatmul.mubr.msk.bf16.gmra.mxu1 %vm165_vm1, %v128_v2  ;;  %295 = vmatprep.mubr.bf16.mxu0 %v3770_v0 }
  0x73   :  { %408 = vmatprep.mubr.bf16.mxu1 %v3770_v0  ;;  %1336 = vmatpush2.bf16.msra.mxu0 %v3387_v5 }
  0x74   :  { %1337 = vmatprep.subr.bf16.mxu0 %v3395_v7  ;;  %1449 = vmatpush2.bf16.msra.mxu1 %v3390_v10 }
  0x75   :  { %1450 = vmatprep.subr.bf16.mxu1 %v3398_v12 }
  0x77   :  { %1338 = vmatpush2.bf16.msra.mxu0 %v3393_v11 }
  0x78   :  { %1451 = vmatpush2.bf16.msra.mxu1 %v3396_v14  ;;  %1339 = vmatprep.subr.bf16.mxu0 %v3401_v15  ;;  %v3426_v14 = vld [vmem:[#allocation8 + $0x2e8] ss:$16 sps:$4 sm:$0xff]  }
  0x79   :  { %3010 = vmatmul.mubr.msk.bf16.gmra.mxu0 %vm165_vm1, %v129_v13  ;;  %1452 = vmatprep.subr.bf16.mxu1 %v3404_v17 }
  0x7a   :  { %3019 = vmatmul.mubr.msk.bf16.gmra.mxu1 %vm165_vm1, %v129_v13  ;;  %305 = vmatprep.mubr.bf16.mxu0 %v3770_v0  ;;  %v3423_v13 = vld [vmem:[#allocation8 + $0xe8] ss:$16 sps:$4 sm:$0xff]  }
  0x7b   :  { %418 = vmatprep.mubr.bf16.mxu1 %v3770_v0  ;;  %1340 = vmatpush2.bf16.msra.mxu0 %v3399_v16  ;;  %v3416_v0 = vld [vmem:[#allocation8 + $0x324] ss:$16 sps:$4 sm:$0xff]  }
  0x7c   :  { %1453 = vmatpush2.bf16.msra.mxu1 %v3402_v20  ;;  %1341 = vmatprep.subr.bf16.mxu0 %v3407_v22  ;;  %v3434_v20 = vld [vmem:[#allocation8 + $0x2cc] ss:$16 sps:$4 sm:$0xff]  }
  0x7d   :  { %1454 = vmatprep.subr.bf16.mxu1 %v3410_v23 }
  0x7f   :  { %1342 = vmatpush2.bf16.msra.mxu0 %v3405_v24 }
  0x80   :  { %1455 = vmatpush2.bf16.msra.mxu1 %v3408_v25  ;;  %1343 = vmatprep.subr.bf16.mxu0 %v3413_v26 }
  0x81   :  { %3011 = vmatmul.mubr.msk.bf16.gmra.mxu0 %vm165_vm1, %v130_v21  ;;  %1456 = vmatprep.subr.bf16.mxu1 %v3416_v0 }
  0x82   :  { %3020 = vmatmul.mubr.msk.bf16.gmra.mxu1 %vm165_vm1, %v130_v21 }
  0x83   :  { %1344 = vmatpush2.bf16.msra.mxu0 %v3411_v27 }
  0x84   :  { %1457 = vmatpush2.bf16.msra.mxu1 %v3414_v28  ;;  %1345 = vmatprep.subr.bf16.mxu0 %v3419_v29 }
  0x85   :  { %1458 = vmatprep.subr.bf16.mxu1 %v3422_v30  ;;  %v3429_v30 = vld [vmem:[#allocation8 + $0xc8] ss:$16 sps:$4 sm:$0xff]  }
  0x87   :  { %1346 = vmatpush2.bf16.msra.mxu0 %v3417_v31  ;;  %v3432_v31 = vld [vmem:[#allocation8 + $0x2c8] ss:$16 sps:$4 sm:$0xff]  }
  0x88   :  { %1459 = vmatpush2.bf16.msra.mxu1 %v3420_v32  ;;  %1541 = vmatprep.subr.bf16.mxu0 %v3425_v33 }
  0x89   :  { %1654 = vmatprep.subr.bf16.mxu1 %v3428_v34 }
 0x109   :  { %v237_v42 = vpop.f32.mrf.mxu0 }
 0x10a   :  { %v350_v43 = vpop.f32.mrf.mxu1  ;;  %v238_v56 = vadd.f32 %v237_v42, %v3901_v46  ;;  %v3437_v42 = vld [vmem:[#allocation8 + $0xac] ss:$16 sps:$4 sm:$0xff]  }
 0x10b   :  { %v239_v48 = vpop.f32.mrf.mxu0  ;;  %v351_v57 = vadd.f32 %v350_v43, %v3905_v47  ;;  %v3440_v43 = vld [vmem:[#allocation8 + $0x2ac] ss:$16 sps:$4 sm:$0xff]  }
 0x10c   :  { %v352_v49 = vpop.f32.mrf.mxu1  ;;  %v240_v52 = vadd.f32 %v239_v48, %v3894_v44  ;;  %v429_v7 = vmax.f32 %v238_v56, 0.0 }
 0x10d   :  { %v241_v50 = vpop.f32.mrf.mxu0  ;;  %v353_v53 = vadd.f32 %v352_v49, %v3898_v45  ;;  %v431_v8 = vmax.f32 %v351_v57, 0.0  ;;  %v3435_v57 = vld [vmem:[#allocation8 + $0xa8] ss:$16 sps:$4 sm:$0xff]  }
 0x10e   :  { %v354_v51 = vpop.f32.mrf.mxu1  ;;  %v242_v54 = vadd.f32 %v241_v50, %v3901_v46  ;;  %v430_v3 = vmax.f32 %v240_v52, 0.0 }
 0x10f   :  { %v355_v55 = vadd.f32 %v354_v51, %v3905_v47  ;;  %v243_v58 = vpop.f32.mrf.mxu0  ;;  %v432_v4 = vmax.f32 %v353_v53, 0.0 }
 0x110   :  { %v356_v59 = vpop.f32.mrf.mxu1  ;;  %v244_v60 = vadd.f32 %v243_v58, %v3894_v44  ;;  %v433_v62 = vmax.f32 %v242_v54, 0.0 }
 0x111   :  { %v357_v61 = vadd.f32 %v356_v59, %v3898_v45  ;;  %v435_v63 = vmax.f32 %v355_v55, 0.0  ;;  %v247_v1 = vpop.f32.mrf.mxu0 }
 0x112   :  { %v360_v2 = vpop.f32.mrf.mxu1  ;;  %v434_v5 = vmax.f32 %v244_v60, 0.0  ;;  %v3919_v15 = vpack.c.bf16 %v433_v62, %v429_v7  ;;  %v248_v24 = vadd.f32 %v247_v1, %v3901_v46  ;;  %v3443_v1 = vld [vmem:[#allocation8 + $0x8c] ss:$16 sps:$4 sm:$0xff]  }
 0x113   :  { %v436_v6 = vmax.f32 %v357_v61, 0.0  ;;  %v249_v9 = vpop.f32.mrf.mxu0  ;;  %v3921_v16 = vpack.c.bf16 %v435_v63, %v431_v8  ;;  %v361_v25 = vadd.f32 %v360_v2, %v3905_v47  ;;  %v3438_v63 = vld [vmem:[#allocation8 + $0x2a8] ss:$16 sps:$4 sm:$0xff]  }
 0x114   :  { %v362_v10 = vpop.f32.mrf.mxu1  ;;  %v3915_v11 = vpack.c.bf16 %v434_v5, %v430_v3  ;;  %v250_v21 = vadd.f32 %v249_v9, %v3894_v44  ;;  %v437_v51 = vmax.f32 %v248_v24, 0.0 }
 0x115   :  { %v3917_v12 = vpack.c.bf16 %v436_v6, %v432_v4  ;;  %v251_v17 = vpop.f32.mrf.mxu0  ;;  %v363_v26 = vadd.f32 %v362_v10, %v3898_v45  ;;  %v439_v52 = vmax.f32 %v361_v25, 0.0  ;;  %v3446_v6 = vld [vmem:[#allocation8 + $0x28c] ss:$16 sps:$4 sm:$0xff]  }
 0x116   :  { %v364_v18 = vpop.f32.mrf.mxu1  ;;  %v252_v22 = vadd.f32 %v251_v17, %v3901_v46  ;;  %1347 = vmatprep.mubr.bf16.mxu0 %v3915_v11  ;;  %v438_v48 = vmax.f32 %v250_v21, 0.0  ;;  %v3441_v17 = vld [vmem:[#allocation8 + $0x88] ss:$16 sps:$4 sm:$0xff]  }
 0x117   :  { %v365_v23 = vadd.f32 %v364_v18, %v3905_v47  ;;  %1460 = vmatprep.mubr.bf16.mxu1 %v3917_v12  ;;  %v253_v0 = vpop.f32.mrf.mxu0  ;;  %1348 = vmatmul.mubr.bf16.vlgmr.msra.gmra.mxu0 %v3919_v15  ;;  %v440_v53 = vmax.f32 %v363_v26, 0.0 }
 0x118   :  { %v366_v27 = vpop.f32.mrf.mxu1  ;;  %1461 = vmatmul.mubr.bf16.vlgmr.msra.gmra.mxu1 %v3921_v16  ;;  %v254_v28 = vadd.f32 %v253_v0, %v3894_v44  ;;  %1542 = vmatpush1.bf16.msra.mxu0 %v3423_v13  ;;  %v441_v32 = vmax.f32 %v252_v22, 0.0  ;;  %v3444_v22 = vld [vmem:[#allocation8 + $0x288] ss:$16 sps:$4 sm:$0xff]  }
 0x119   :  { %v367_v29 = vadd.f32 %v366_v27, %v3898_v45  ;;  %1655 = vmatpush1.bf16.msra.mxu1 %v3426_v14  ;;  %v443_v33 = vmax.f32 %v365_v23, 0.0  ;;  %v257_v34 = vpop.f32.mrf.mxu0  ;;  %1543 = vmatprep.subr.bf16.mxu0 %v3431_v19  ;;  %v3449_v23 = vld [vmem:[#allocation8 + $0x6c] ss:$16 sps:$4 sm:$0xff]  }
 0x11a   :  { %v370_v41 = vpop.f32.mrf.mxu1  ;;  %1656 = vmatprep.subr.bf16.mxu1 %v3434_v20  ;;  %v442_v49 = vmax.f32 %v254_v28, 0.0  ;;  %v3937_v58 = vpack.c.bf16 %v441_v32, %v437_v51  ;;  %v258_v7 = vadd.f32 %v257_v34, %v3901_v46  ;;  %v3447_v34 = vld [vmem:[#allocation8 + $0x68] ss:$16 sps:$4 sm:$0xff]   ;;  %v3455_v51 = vld [vmem:[#allocation8 + $0x4c] ss:$16 sps:$4 sm:$0xff]  }
 0x11b   :  { %v444_v50 = vmax.f32 %v367_v29, 0.0  ;;  %v259_v54 = vpop.f32.mrf.mxu0  ;;  %v3939_v59 = vpack.c.bf16 %v443_v33, %v439_v52  ;;  %v371_v8 = vadd.f32 %v370_v41, %v3905_v47 }
 0x11c   :  { %v372_v55 = vpop.f32.mrf.mxu1  ;;  %1544 = vmatpush1.bf16.msra.mxu0 %v3429_v30  ;;  %v3935_v56 = vpack.c.bf16 %v442_v49, %v438_v48  ;;  %v260_v2 = vadd.f32 %v259_v54, %v3894_v44  ;;  %v445_v27 = vmax.f32 %v258_v7, 0.0 }
 0x11d   :  { %1657 = vmatpush1.bf16.msra.mxu1 %v3432_v31  ;;  %v261_v60 = vpop.f32.mrf.mxu0  ;;  %v3941_v62 = vpack.c.bf16 %v444_v50, %v440_v53  ;;  %1545 = vmatprep.subr.bf16.mxu0 %v3437_v42  ;;  %v373_v3 = vadd.f32 %v372_v55, %v3898_v45  ;;  %v447_v28 = vmax.f32 %v371_v8, 0.0  ;;  %v3452_v31 = vld [vmem:[#allocation8 + $0x26c] ss:$16 sps:$4 sm:$0xff]   ;;  %v3450_v50 = vld [vmem:[#allocation8 + $0x268] ss:$16 sps:$4 sm:$0xff]  }
 0x11e   :  { %v374_v61 = vpop.f32.mrf.mxu1  ;;  %1658 = vmatprep.subr.bf16.mxu1 %v3440_v43  ;;  %v262_v4 = vadd.f32 %v261_v60, %v3901_v46  ;;  %1357 = vmatprep.mubr.bf16.mxu0 %v3935_v56  ;;  %v446_v24 = vmax.f32 %v260_v2, 0.0  ;;  %v3458_v55 = vld [vmem:[#allocation8 + $0x24c] ss:$16 sps:$4 sm:$0xff]   ;;  %v3456_v8 = vld [vmem:[#allocation8 + $0x248] ss:$16 sps:$4 sm:$0xff]  }
 0x11f   :  { %v375_v5 = vadd.f32 %v374_v61, %v3905_v47  ;;  %1470 = vmatprep.mubr.bf16.mxu1 %v3941_v62  ;;  %v263_v9 = vpop.f32.mrf.mxu0  ;;  %1358 = vmatmul.mubr.bf16.gmra.mxu0 %v3937_v58  ;;  %v448_v25 = vmax.f32 %v373_v3, 0.0  ;;  %v3453_v3 = vld [vmem:[#allocation8 + $0x48] ss:$16 sps:$4 sm:$0xff]  }
 0x120   :  { %v376_v10 = vpop.f32.mrf.mxu1  ;;  %v264_v13 = vadd.f32 %v263_v9, %v3894_v44  ;;  %1471 = vmatmul.mubr.bf16.gmra.mxu1 %v3939_v59  ;;  %1546 = vmatpush1.bf16.msra.mxu0 %v3435_v57  ;;  %v449_v18 = vmax.f32 %v262_v4, 0.0  ;;  %v3461_v9 = vld [vmem:[#allocation8 + $0x2c] ss:$16 sps:$4 sm:$0xff]  }
 0x121   :  { %v377_v14 = vadd.f32 %v376_v10, %v3898_v45  ;;  %v451_v19 = vmax.f32 %v375_v5, 0.0  ;;  %1659 = vmatpush1.bf16.msra.mxu1 %v3438_v63  ;;  %v267_v20 = vpop.f32.mrf.mxu0  ;;  %1547 = vmatprep.subr.bf16.mxu0 %v3443_v1 }
 0x122   :  { %v380_v21 = vpop.f32.mrf.mxu1  ;;  %v450_v26 = vmax.f32 %v264_v13, 0.0  ;;  %1660 = vmatprep.subr.bf16.mxu1 %v3446_v6  ;;  %v3959_v41 = vpack.c.bf16 %v449_v18, %v445_v27  ;;  %v268_v57 = vadd.f32 %v267_v20, %v3901_v46 }
 0x123   :  { %v452_v0 = vmax.f32 %v377_v14, 0.0  ;;  %v269_v29 = vpop.f32.mrf.mxu0  ;;  %v3961_v42 = vpack.c.bf16 %v451_v19, %v447_v28  ;;  %v381_v60 = vadd.f32 %v380_v21, %v3905_v47 }
 0x124   :  { %v382_v30 = vpop.f32.mrf.mxu1  ;;  %1548 = vmatpush1.bf16.msra.mxu0 %v3441_v17  ;;  %v3955_v32 = vpack.c.bf16 %v450_v26, %v446_v24  ;;  %v270_v43 = vadd.f32 %v269_v29, %v3894_v44  ;;  %v453_v18 = vmax.f32 %v268_v57, 0.0  ;;  %v3465_v57 = vld [vmem:[#allocation8 + $0x8] ss:$16 sps:$4 sm:$0xff]  }
 0x125   :  { %v3957_v33 = vpack.c.bf16 %v452_v0, %v448_v25  ;;  %1661 = vmatpush1.bf16.msra.mxu1 %v3444_v22  ;;  %v271_v48 = vpop.f32.mrf.mxu0  ;;  %1549 = vmatprep.subr.bf16.mxu0 %v3449_v23  ;;  %v383_v52 = vadd.f32 %v382_v30, %v3898_v45  ;;  %v455_v19 = vmax.f32 %v381_v60, 0.0  ;;  %v3464_v22 = vld [vmem:[#allocation8 + $0x22c] ss:$16 sps:$4 sm:$0xff]   ;;  %v3459_v25 = vld [vmem:[#allocation8 + $0x28] ss:$16 sps:$4 sm:$0xff]  }
 0x126   :  { %v384_v49 = vpop.f32.mrf.mxu1  ;;  %v272_v53 = vadd.f32 %v271_v48, %v3901_v46  ;;  %1367 = vmatprep.mubr.bf16.mxu0 %v3955_v32  ;;  %1662 = vmatprep.subr.bf16.mxu1 %v3452_v31  ;;  %v454_v10 = vmax.f32 %v270_v43, 0.0  ;;  %v3462_v30 = vld [vmem:[#allocation8 + $0x228] ss:$16 sps:$4 sm:$0xff]   ;;  %v3467_v31 = vld [vmem:[#allocation8 + $0xc] ss:$16 sps:$4 sm:$0xff]  }
 0x127   :  { %v385_v54 = vadd.f32 %v384_v49, %v3905_v47  ;;  %1480 = vmatprep.mubr.bf16.mxu1 %v3957_v33  ;;  %v273_v61 = vpop.f32.mrf.mxu0  ;;  %1368 = vmatmul.mubr.bf16.gmra.mxu0 %v3959_v41  ;;  %v456_v13 = vmax.f32 %v383_v52, 0.0  ;;  %v3470_v49 = vld [vmem:[#allocation8 + $0x20c] ss:$16 sps:$4 sm:$0xff]  }
 0x128   :  { %v386_v63 = vpop.f32.mrf.mxu1  ;;  %v274_v1 = vadd.f32 %v273_v61, %v3894_v44  ;;  %1481 = vmatmul.mubr.bf16.gmra.mxu1 %v3961_v42  ;;  %1550 = vmatpush1.bf16.msra.mxu0 %v3447_v34  ;;  %v457_v4 = vmax.f32 %v272_v53, 0.0 }
 0x129   :  { %v387_v2 = vadd.f32 %v386_v63, %v3898_v45  ;;  %v459_v5 = vmax.f32 %v385_v54, 0.0  ;;  %1663 = vmatpush1.bf16.msra.mxu1 %v3450_v50  ;;  %v277_v6 = vpop.f32.mrf.mxu0  ;;  %1551 = vmatprep.subr.bf16.mxu0 %v3455_v51 }
 0x12a   :  { %v390_v7 = vpop.f32.mrf.mxu1  ;;  %v458_v14 = vmax.f32 %v274_v1, 0.0  ;;  %1664 = vmatprep.subr.bf16.mxu1 %v3458_v55  ;;  %v3979_v26 = vpack.c.bf16 %v457_v4, %v453_v18  ;;  %v278_v50 = vadd.f32 %v277_v6, %v3901_v46 }
 0x12b   :  { %v460_v17 = vmax.f32 %v387_v2, 0.0  ;;  %v279_v20 = vpop.f32.mrf.mxu0  ;;  %v3981_v0 = vpack.c.bf16 %v459_v5, %v455_v19  ;;  %v391_v51 = vadd.f32 %v390_v7, %v3905_v47  ;;  %v3468_v2 = vld [vmem:[#allocation8 + $0x208] ss:$16 sps:$4 sm:$0xff]  }
 0x12c   :  { %v392_v21 = vpop.f32.mrf.mxu1  ;;  %1552 = vmatpush1.bf16.msra.mxu0 %v3453_v3  ;;  %v3975_v23 = vpack.c.bf16 %v458_v14, %v454_v10  ;;  %v280_v27 = vadd.f32 %v279_v20, %v3894_v44  ;;  %v3473_v3 = vld [vmem:[#allocation8 + $0x1ec] ss:$16 sps:$4 sm:$0xff]   ;;  %v3471_v19 = vld [vmem:[#allocation8 + $0x1e8] ss:$16 sps:$4 sm:$0xff]  }
 0x12d   :  { %v3977_v24 = vpack.c.bf16 %v460_v17, %v456_v13  ;;  %1665 = vmatpush1.bf16.msra.mxu1 %v3456_v8  ;;  %v281_v28 = vpop.f32.mrf.mxu0  ;;  %1553 = vmatprep.subr.bf16.mxu0 %v3461_v9  ;;  %v393_v34 = vadd.f32 %v392_v21, %v3898_v45  ;;  %v461_v8 = vmax.f32 %v278_v50, 0.0  ;;  %v463_v9 = vmax.f32 %v391_v51, 0.0  ;;  %v3476_v14 = vld [vmem:[#allocation8 + $0x3ec] ss:$16 sps:$4 sm:$0xff]  }
 0x12e   :  { %v394_v29 = vpop.f32.mrf.mxu1  ;;  %v282_v43 = vadd.f32 %v281_v28, %v3901_v46  ;;  %1377 = vmatprep.mubr.bf16.mxu0 %v3975_v23  ;;  %1666 = vmatprep.subr.bf16.mxu1 %v3464_v22  ;;  %v462_v4 = vmax.f32 %v280_v27, 0.0  ;;  %v3474_v28 = vld [vmem:[#allocation8 + $0x3e8] ss:$16 sps:$4 sm:$0xff]  }
 0x12f   :  { %v395_v48 = vadd.f32 %v394_v29, %v3905_v47  ;;  %1490 = vmatprep.mubr.bf16.mxu1 %v3977_v24  ;;  %v283_v52 = vpop.f32.mrf.mxu0  ;;  %1378 = vmatmul.mubr.bf16.gmra.mxu0 %v3979_v26  ;;  %v464_v5 = vmax.f32 %v393_v34, 0.0  ;;  %v3479_v29 = vld [vmem:[#allocation8 + $0x1cc] ss:$16 sps:$4 sm:$0xff]  }
 0x130   :  { %v396_v53 = vpop.f32.mrf.mxu1  ;;  %v284_v54 = vadd.f32 %v283_v52, %v3894_v44  ;;  %1491 = vmatmul.mubr.bf16.gmra.mxu1 %v3981_v0  ;;  %1554 = vmatpush1.bf16.msra.mxu0 %v3459_v25  ;;  %v465_v60 = vmax.f32 %v282_v43, 0.0  ;;  %v3482_v43 = vld [vmem:[#allocation8 + $0x3cc] ss:$16 sps:$4 sm:$0xff]  }
 0x131   :  { %v397_v55 = vadd.f32 %v396_v53, %v3898_v45  ;;  %v467_v61 = vmax.f32 %v395_v48, 0.0  ;;  %1667 = vmatpush1.bf16.msra.mxu1 %v3462_v30  ;;  %v287_v63 = vpop.f32.mrf.mxu0  ;;  %1555 = vmatprep.subr.bf16.mxu0 %v3467_v31 }
 0x132   :  { %v400_v1 = vpop.f32.mrf.mxu1  ;;  %v466_v6 = vmax.f32 %v284_v54, 0.0  ;;  %1668 = vmatprep.subr.bf16.mxu1 %v3470_v49  ;;  %v3999_v20 = vpack.c.bf16 %v465_v60, %v461_v8  ;;  %v288_v48 = vadd.f32 %v287_v63, %v3901_v46  ;;  %v3477_v54 = vld [vmem:[#allocation8 + $0x1c8] ss:$16 sps:$4 sm:$0xff]  }
 0x133   :  { %v468_v7 = vmax.f32 %v397_v55, 0.0  ;;  %v289_v10 = vpop.f32.mrf.mxu0  ;;  %v4001_v21 = vpack.c.bf16 %v467_v61, %v463_v9  ;;  %v401_v49 = vadd.f32 %v400_v1, %v3905_v47  ;;  %v3480_v63 = vld [vmem:[#allocation8 + $0x3c8] ss:$16 sps:$4 sm:$0xff]   ;;  %v3485_v1 = vld [vmem:[#allocation8 + $0x1ac] ss:$16 sps:$4 sm:$0xff]  }
 0x134   :  { %v402_v13 = vpop.f32.mrf.mxu1  ;;  %1556 = vmatpush1.bf16.msra.mxu0 %v3465_v57  ;;  %v3995_v17 = vpack.c.bf16 %v466_v6, %v462_v4  ;;  %v290_v22 = vadd.f32 %v289_v10, %v3894_v44  ;;  %v469_v6 = vmax.f32 %v288_v48, 0.0  ;;  %v3488_v10 = vld [vmem:[#allocation8 + $0x3ac] ss:$16 sps:$4 sm:$0xff]  }
 0x135   :  { %v3997_v18 = vpack.c.bf16 %v468_v7, %v464_v5  ;;  %1669 = vmatpush1.bf16.msra.mxu1 %v3468_v2  ;;  %v291_v25 = vpop.f32.mrf.mxu0  ;;  %1557 = vmatprep.subr.bf16.mxu0 %v3473_v3  ;;  %v403_v30 = vadd.f32 %v402_v13, %v3898_v45  ;;  %v471_v7 = vmax.f32 %v401_v49, 0.0  ;;  %v3494_v49 = vld [vmem:[#allocation8 + $0x38c] ss:$16 sps:$4 sm:$0xff]  }
 0x136   :  { %v404_v27 = vpop.f32.mrf.mxu1  ;;  %v292_v31 = vadd.f32 %v291_v25, %v3901_v46  ;;  %1387 = vmatprep.mubr.bf16.mxu0 %v3995_v17  ;;  %1670 = vmatprep.subr.bf16.mxu1 %v3476_v14  ;;  %v470_v2 = vmax.f32 %v290_v22, 0.0 }
 0x137   :  { %v405_v34 = vadd.f32 %v404_v27, %v3905_v47  ;;  %1500 = vmatprep.mubr.bf16.mxu1 %v3997_v18  ;;  %v293_v50 = vpop.f32.mrf.mxu0  ;;  %1388 = vmatmul.mubr.bf16.gmra.mxu0 %v3999_v20  ;;  %v472_v3 = vmax.f32 %v403_v30, 0.0  ;;  %v3486_v30 = vld [vmem:[#allocation8 + $0x3a8] ss:$16 sps:$4 sm:$0xff]  }
 0x138   :  { %v406_v51 = vpop.f32.mrf.mxu1  ;;  %v294_v52 = vadd.f32 %v293_v50, %v3894_v44  ;;  %1501 = vmatmul.mubr.bf16.gmra.mxu1 %v4001_v21  ;;  %1558 = vmatpush2.bf16.msra.mxu0 %v3471_v19  ;;  %v473_v55 = vmax.f32 %v292_v31, 0.0  ;;  %v3483_v19 = vld [vmem:[#allocation8 + $0x1a8] ss:$16 sps:$4 sm:$0xff]   ;;  %v3491_v31 = vld [vmem:[#allocation8 + $0x18c] ss:$16 sps:$4 sm:$0xff]  }
 0x139   :  { %v407_v53 = vadd.f32 %v406_v51, %v3898_v45  ;;  %v475_v57 = vmax.f32 %v405_v34, 0.0  ;;  %1671 = vmatpush2.bf16.msra.mxu1 %v3474_v28  ;;  %v297_v60 = vpop.f32.mrf.mxu0  ;;  %1559 = vmatprep.subr.bf16.mxu0 %v3479_v29 }
 0x13a   :  { %v410_v61 = vpop.f32.mrf.mxu1  ;;  %v474_v4 = vmax.f32 %v294_v52, 0.0  ;;  %1672 = vmatprep.subr.bf16.mxu1 %v3482_v43  ;;  %v4019_v25 = vpack.c.bf16 %v473_v55, %v469_v6  ;;  %v298_v50 = vadd.f32 %v297_v60, %v3901_v46 }
 0x13b   :  { %v476_v5 = vmax.f32 %v407_v53, 0.0  ;;  %v299_v8 = vpop.f32.mrf.mxu0  ;;  %v4021_v27 = vpack.c.bf16 %v475_v57, %v471_v7  ;;  %v411_v51 = vadd.f32 %v410_v61, %v3905_v47  ;;  %v3489_v57 = vld [vmem:[#allocation8 + $0x188] ss:$16 sps:$4 sm:$0xff]  }
 0x13c   :  { %v412_v9 = vpop.f32.mrf.mxu1  ;;  %1560 = vmatpush2.bf16.msra.mxu0 %v3477_v54  ;;  %v4015_v13 = vpack.c.bf16 %v474_v4, %v470_v2  ;;  %v300_v22 = vadd.f32 %v299_v8, %v3894_v44  ;;  %v3492_v61 = vld [vmem:[#allocation8 + $0x388] ss:$16 sps:$4 sm:$0xff]   ;;  %v477_v8 = vmax.f32 %v298_v50, 0.0 }
 0x13d   :  { %v4017_v14 = vpack.c.bf16 %v476_v5, %v472_v3  ;;  %1673 = vmatpush2.bf16.msra.mxu1 %v3480_v63  ;;  %v301_v28 = vpop.f32.mrf.mxu0  ;;  %1561 = vmatprep.subr.bf16.mxu0 %v3485_v1  ;;  %v413_v34 = vadd.f32 %v412_v9, %v3898_v45  ;;  %v3497_v3 = vld [vmem:[#allocation8 + $0x16c] ss:$16 sps:$4 sm:$0xff]   ;;  %v479_v9 = vmax.f32 %v411_v51, 0.0  ;;  %v3498_v50 = vld [vmem:[#allocation8 + $0x368] ss:$16 sps:$4 sm:$0xff]  }
 0x13e   :  { %v414_v29 = vpop.f32.mrf.mxu1  ;;  %v302_v43 = vadd.f32 %v301_v28, %v3901_v46  ;;  %1397 = vmatprep.mubr.bf16.mxu0 %v4015_v13  ;;  %1674 = vmatprep.subr.bf16.mxu1 %v3488_v10  ;;  %v478_v4 = vmax.f32 %v300_v22, 0.0  ;;  %v3503_v51 = vld [vmem:[#allocation8 + $0x14c] ss:$16 sps:$4 sm:$0xff]  }
 0x13f   :  { %v415_v48 = vadd.f32 %v414_v29, %v3905_v47  ;;  %1510 = vmatprep.mubr.bf16.mxu1 %v4017_v14  ;;  %v303_v52 = vpop.f32.mrf.mxu0  ;;  %1398 = vmatmul.mubr.bf16.gmra.mxu0 %v4019_v25  ;;  %v480_v5 = vmax.f32 %v413_v34, 0.0  ;;  %v3500_v29 = vld [vmem:[#allocation8 + $0x36c] ss:$16 sps:$4 sm:$0xff]  }
 0x140   :  { %v416_v53 = vpop.f32.mrf.mxu1  ;;  %v304_v54 = vadd.f32 %v303_v52, %v3894_v44  ;;  %1511 = vmatmul.mubr.bf16.gmra.mxu1 %v4021_v27  ;;  %1562 = vmatpush2.bf16.msra.mxu0 %v3483_v19  ;;  %v481_v63 = vmax.f32 %v302_v43, 0.0 }
 0x141   :  { %v417_v55 = vadd.f32 %v416_v53, %v3898_v45  ;;  %v483_v1 = vmax.f32 %v415_v48, 0.0  ;;  %1675 = vmatpush2.bf16.msra.mxu1 %v3486_v30  ;;  %v307_v2 = vpop.f32.mrf.mxu0  ;;  %1563 = vmatprep.subr.bf16.mxu0 %v3491_v31  ;;  %v3495_v30 = vld [vmem:[#allocation8 + $0x168] ss:$16 sps:$4 sm:$0xff]  }
 0x142   :  { %v420_v60 = vpop.f32.mrf.mxu1  ;;  %v482_v6 = vmax.f32 %v304_v54, 0.0  ;;  %1676 = vmatprep.subr.bf16.mxu1 %v3494_v49  ;;  %v4039_v48 = vpack.c.bf16 %v481_v63, %v477_v8 }
 0x143   :  { %v484_v7 = vmax.f32 %v417_v55, 0.0  ;;  %v309_v10 = vpop.f32.mrf.mxu0  ;;  %v4041_v31 = vpack.c.bf16 %v483_v1, %v479_v9  ;;  %v3506_v55 = vld [vmem:[#allocation8 + $0x34c] ss:$16 sps:$4 sm:$0xff]  }
 0x144   :  { %v422_v28 = vpop.f32.mrf.mxu1  ;;  %1564 = vmatpush2.bf16.msra.mxu0 %v3489_v57  ;;  %v4035_v19 = vpack.c.bf16 %v482_v6, %v478_v4  ;;  %v310_v22 = vadd.f32 %v309_v10, %v3894_v44  ;;  %v308_v57 = vadd.f32 %v307_v2, %v3901_v46  ;;  %v3509_v2 = vld [vmem:[#allocation8 + $0x12c] ss:$16 sps:$4 sm:$0xff]  }
 0x145   :  { %v4037_v43 = vpack.c.bf16 %v484_v7, %v480_v5  ;;  %1677 = vmatpush2.bf16.msra.mxu1 %v3492_v61  ;;  %v311_v34 = vpop.f32.mrf.mxu0  ;;  %1565 = vmatprep.subr.bf16.mxu0 %v3497_v3  ;;  %v423_v52 = vadd.f32 %v422_v28, %v3898_v45  ;;  %v421_v61 = vadd.f32 %v420_v60, %v3905_v47  ;;  %v3501_v5 = vld [vmem:[#allocation8 + $0x148] ss:$16 sps:$4 sm:$0xff]   ;;  %v3512_v60 = vld [vmem:[#allocation8 + $0x32c] ss:$16 sps:$4 sm:$0xff]  }
 0x146   :  { %v424_v49 = vpop.f32.mrf.mxu1  ;;  %v312_v53 = vadd.f32 %v311_v34, %v3901_v46  ;;  %1407 = vmatprep.mubr.bf16.mxu0 %v4035_v19  ;;  %1678 = vmatprep.subr.bf16.mxu1 %v3500_v29  ;;  %v486_v6 = vmax.f32 %v310_v22, 0.0  ;;  %v3504_v46 = vld [vmem:[#allocation8 + $0x348] ss:$16 sps:$4 sm:$0xff]  }
 0x147   :  { %v425_v54 = vadd.f32 %v424_v49, %v3905_v47  ;;  %1520 = vmatprep.mubr.bf16.mxu1 %v4037_v43  ;;  %v313_v63 = vpop.f32.mrf.mxu0  ;;  %1408 = vmatmul.mubr.bf16.gmra.mxu0 %v4039_v48  ;;  %v488_v8 = vmax.f32 %v423_v52, 0.0  ;;  %v485_v47 = vmax.f32 %v308_v57, 0.0  ;;  %v3510_v34 = vld [vmem:[#allocation8 + $0x328] ss:$16 sps:$4 sm:$0xff]   ;;  %v3524_v57 = vld [vmem:[#allocation9 + $0x64] ss:$8 sps:$4 sm:$0xff]  }
 0x148   :  { %v426_v1 = vpop.f32.mrf.mxu1  ;;  %v314_v3 = vadd.f32 %v313_v63, %v3894_v44  ;;  %1521 = vmatmul.mubr.bf16.gmra.mxu1 %v4041_v31  ;;  %1566 = vmatpush2.bf16.msra.mxu0 %v3495_v30  ;;  %v489_v7 = vmax.f32 %v312_v53, 0.0  ;;  %v487_v44 = vmax.f32 %v421_v61, 0.0  ;;  %v3507_v30 = vld [vmem:[#allocation8 + $0x128] ss:$16 sps:$4 sm:$0xff]   ;;  %v3527_v63 = vld [vmem:[#allocation9 + $0x54] ss:$8 sps:$4 sm:$0xff]  }
 0x149   :  { %v427_v4 = vadd.f32 %v426_v1, %v3898_v45  ;;  %1679 = vmatpush2.bf16.msra.mxu1 %v3498_v50  ;;  %1567 = vmatprep.subr.bf16.mxu0 %v3503_v51  ;;  %v491_v9 = vmax.f32 %v425_v54, 0.0  ;;  %v3515_v50 = vld [vmem:[#allocation8 + $0x10c] ss:$16 sps:$4 sm:$0xff]   ;;  %v3513_v52 = vld [vmem:[#allocation8 + $0x108] ss:$16 sps:$4 sm:$0xff]  }
 0x14a   :  { %v490_v10 = vmax.f32 %v314_v3, 0.0  ;;  %1680 = vmatprep.subr.bf16.mxu1 %v3506_v55  ;;  %v4059_v22 = vpack.c.bf16 %v489_v7, %v485_v47  ;;  %v3518_v51 = vld [vmem:[#allocation8 + $0x30c] ss:$16 sps:$4 sm:$0xff]   ;;  %v3516_v53 = vld [vmem:[#allocation8 + $0x308] ss:$16 sps:$4 sm:$0xff]  }
 0x14b   :  { %v492_v28 = vmax.f32 %v427_v4, 0.0  ;;  %v4061_v49 = vpack.c.bf16 %v491_v9, %v487_v44  ;;  %v3521_v54 = vld [vmem:[#allocation9 + $0x74] ss:$8 sps:$4 sm:$0xff]   ;;  %v3519_v55 = vld [vmem:[#allocation9 + $0x70] ss:$8 sps:$4 sm:$0xff]  }
 0x14c   :  { %1568 = vmatpush2.bf16.msra.mxu0 %v3501_v5  ;;  %v4055_v45 = vpack.c.bf16 %v490_v10, %v486_v6  ;;  %v3530_v1 = vld [vmem:[#allocation9 + $0x44] ss:$8 sps:$4 sm:$0xff]   ;;  %v3569_v61 = vld [vmem:[#allocation9 + $0x174] ss:$8 sps:$4 sm:$0xff]   ;;  %v3570_v3 = vld [vmem:[#allocation9 + $0x160] ss:$8 sps:$4 sm:$0xff]  }
 0x14d   :  { %v4057_v29 = vpack.c.bf16 %v492_v28, %v488_v8  ;;  %1681 = vmatpush2.bf16.msra.mxu1 %v3504_v46  ;;  %1569 = vmatprep.subr.bf16.mxu0 %v3509_v2  ;;  %v3537_v4 = vld [vmem:[#allocation9 + $0x10] ss:$8 sps:$4 sm:$0xff]   ;;  %v3545_v5 = vld [vmem:[#allocation9 + $0xf4] ss:$8 sps:$4 sm:$0xff]   ;;  %v3578_v6 = vld [vmem:[#allocation9 + $0x144] ss:$8 sps:$4 sm:$0xff]  }
 0x14e   :  { %1417 = vmatprep.mubr.bf16.mxu0 %v4055_v45  ;;  %1682 = vmatprep.subr.bf16.mxu1 %v3512_v60  ;;  %v3576_v7 = vld [vmem:[#allocation9 + $0x140] ss:$8 sps:$4 sm:$0xff]   ;;  %v3543_v46 = vld [vmem:[#allocation9 + $0xf0] ss:$8 sps:$4 sm:$0xff]   ;;  %v3551_v2 = vld [vmem:[#allocation9 + $0xd4] ss:$8 sps:$4 sm:$0xff]  }
 0x14f   :  { %1530 = vmatprep.mubr.bf16.mxu1 %v4057_v29  ;;  %1418 = vmatmul.mubr.bf16.gmra.mxu0 %v4059_v22  ;;  %v3584_v8 = vld [vmem:[#allocation9 + $0x124] ss:$8 sps:$4 sm:$0xff]   ;;  %v3582_v9 = vld [vmem:[#allocation9 + $0x120] ss:$8 sps:$4 sm:$0xff]   ;;  %v3549_v10 = vld [vmem:[#allocation9 + $0xd0] ss:$8 sps:$4 sm:$0xff]  }
 0x150   :  { %1531 = vmatmul.mubr.bf16.gmra.mxu1 %v4061_v49  ;;  %1570 = vmatpush2.bf16.msra.mxu0 %v3507_v30  ;;  %v3557_v28 = vld [vmem:[#allocation9 + $0xb4] ss:$8 sps:$4 sm:$0xff]   ;;  %v3590_v47 = vld [vmem:[#allocation9 + $0x104] ss:$8 sps:$4 sm:$0xff]   ;;  %v3588_v60 = vld [vmem:[#allocation9 + $0x100] ss:$8 sps:$4 sm:$0xff]  }
 0x151   :  { %1573 = vmatprep.mubr.bf16.mxu0 %v3915_v11  ;;  %1683 = vmatpush2.bf16.msra.mxu1 %v3510_v34  ;;  %v3522_v11 = vld [vmem:[#allocation9 + $0x60] ss:$8 sps:$4 sm:$0xff]   ;;  %v3555_v44 = vld [vmem:[#allocation9 + $0xb0] ss:$8 sps:$4 sm:$0xff]   ;;  %v3563_v30 = vld [vmem:[#allocation9 + $0x94] ss:$8 sps:$4 sm:$0xff]  }
 0x152   :  { %1686 = vmatprep.mubr.bf16.mxu1 %v3917_v12  ;;  %1571 = vmatprep.subr.bf16.mxu0 %v3515_v50  ;;  %v3525_v12 = vld [vmem:[#allocation9 + $0x50] ss:$8 sps:$4 sm:$0xff]   ;;  %v3596_v34 = vld [vmem:[#allocation9 + $0x1e4] ss:$8 sps:$4 sm:$0xff]   ;;  %v3594_v50 = vld [vmem:[#allocation9 + $0x1e0] ss:$8 sps:$4 sm:$0xff]  }
 0x153   :  { %1684 = vmatprep.subr.bf16.mxu1 %v3518_v51  ;;  %v3561_v51 = vld [vmem:[#allocation9 + $0x90] ss:$8 sps:$4 sm:$0xff]  }
 0x154   :  { %1572 = vmatpush2.bf16.msra.mxu0 %v3513_v52  ;;  %v3602_v52 = vld [vmem:[#allocation9 + $0x1c4] ss:$8 sps:$4 sm:$0xff]  }
 0x155   :  { %1685 = vmatpush2.bf16.msra.mxu1 %v3516_v53  ;;  %2259 = vmatprep.subr.bf16.mxu0 %v3521_v54  ;;  %v3600_v53 = vld [vmem:[#allocation9 + $0x1c0] ss:$8 sps:$4 sm:$0xff]   ;;  %v3605_v54 = vld [vmem:[#allocation9 + $0x1b4] ss:$8 sps:$4 sm:$0xff]  }
 0x156   :  { %2372 = vmatprep.subr.bf16.mxu1 %v3569_v61 }
 0x157   :  { %1574 = vmatmul.mubr.bf16.vlgmr.msra.gmra.mxu0 %v3919_v15  ;;  %v3528_v15 = vld [vmem:[#allocation9 + $0x40] ss:$8 sps:$4 sm:$0xff]  }
 0x158   :  { %1687 = vmatmul.mubr.bf16.vlgmr.msra.gmra.mxu1 %v3921_v16  ;;  %1583 = vmatprep.mubr.bf16.mxu0 %v3935_v56  ;;  %v3533_v16 = vld [vmem:[#allocation9 + $0x34] ss:$8 sps:$4 sm:$0xff]   ;;  %v3531_v56 = vld [vmem:[#allocation9 + $0x30] ss:$8 sps:$4 sm:$0xff]  }
 0x159   :  { %1696 = vmatprep.mubr.bf16.mxu1 %v3941_v62  ;;  %2260 = vmatpush1.bf16.msra.mxu0 %v3519_v55  ;;  %v3536_v62 = vld [vmem:[#allocation9 + $0x24] ss:$8 sps:$4 sm:$0xff]   ;;  %v3603_v55 = vld [vmem:[#allocation9 + $0x1b0] ss:$8 sps:$4 sm:$0xff]  }
 0x15a   :  { %2261 = vmatprep.subr.bf16.mxu0 %v3524_v57  ;;  %v3606_v57 = vld [vmem:[#allocation9 + $0x1a0] ss:$8 sps:$4 sm:$0xff]  }
 0x15d   :  { %2262 = vmatpush1.bf16.msra.mxu0 %v3522_v11  ;;  %v3609_v11 = vld [vmem:[#allocation9 + $0x190] ss:$8 sps:$4 sm:$0xff]  }
 0x15e   :  { %2263 = vmatprep.subr.bf16.mxu0 %v3527_v63  ;;  %v3614_v63 = vld [vmem:[#allocation9 + $0x184] ss:$8 sps:$4 sm:$0xff]  }
 0x15f   :  { %1584 = vmatmul.mubr.bf16.gmra.mxu0 %v3937_v58  ;;  %v3567_v58 = vld [vmem:[#allocation9 + $0x170] ss:$8 sps:$4 sm:$0xff]  }
 0x160   :  { %1697 = vmatmul.mubr.bf16.gmra.mxu1 %v3939_v59  ;;  %1593 = vmatprep.mubr.bf16.mxu0 %v3955_v32  ;;  %v3534_v59 = vld [vmem:[#allocation9 + $0x20] ss:$8 sps:$4 sm:$0xff]   ;;  %v3539_v32 = vld [vmem:[#allocation9 + $0x14] ss:$8 sps:$4 sm:$0xff]  }
 0x161   :  { %1706 = vmatprep.mubr.bf16.mxu1 %v3957_v33  ;;  %2264 = vmatpush1.bf16.msra.mxu0 %v3525_v12  ;;  %v3572_v33 = vld [vmem:[#allocation9 + $0x164] ss:$8 sps:$4 sm:$0xff]   ;;  %v3612_v12 = vld [vmem:[#allocation9 + $0x180] ss:$8 sps:$4 sm:$0xff]  }
 0x162   :  { %2265 = vmatprep.subr.bf16.mxu0 %v3530_v1  ;;  %2373 = vmatpush1.bf16.msra.mxu1 %v3567_v58  ;;  %v4102_v1 = vld [vmem:[%s4371_s4] sm:$0xf] }
 0x163   :  { %2374 = vmatprep.subr.bf16.mxu1 %v3572_v33 }
 0x165   :  { %2266 = vmatpush1.bf16.msra.mxu0 %v3528_v15  ;;  %v4106_v15 = vrot.slane %v4102_v1, %v3883_v37 }
 0x166   :  { %2267 = vmatprep.subr.bf16.mxu0 %v3533_v16  ;;  %2375 = vmatpush1.bf16.msra.mxu1 %v3570_v3  ;;  %v4110_v16 = vrot.slane %v4102_v1, %v3887_v39 }
 0x167   :  { %1594 = vmatmul.mubr.bf16.gmra.mxu0 %v3959_v41  ;;  %v3542_v41 = vld [vmem:[#allocation9 + $0x4] ss:$8 sps:$4 sm:$0xff]  }
 0x168   :  { %1707 = vmatmul.mubr.bf16.gmra.mxu1 %v3961_v42  ;;  %1603 = vmatprep.mubr.bf16.mxu0 %v3975_v23  ;;  %v3575_v42 = vld [vmem:[#allocation9 + $0x154] ss:$8 sps:$4 sm:$0xff]   ;;  %v3573_v23 = vld [vmem:[#allocation9 + $0x150] ss:$8 sps:$4 sm:$0xff]  }
 0x169   :  { %1716 = vmatprep.mubr.bf16.mxu1 %v3977_v24  ;;  %2268 = vmatpush1.bf16.msra.mxu0 %v3531_v56  ;;  %v3540_v24 = vld [vmem:[#allocation9] ss:$8 sps:$4 sm:$0xff]  }
 0x16a   :  { %2269 = vmatprep.subr.bf16.mxu0 %v3536_v62  ;;  %2376 = vmatprep.subr.bf16.mxu1 %v3575_v42 }
 0x16b   :  { %2377 = vmatpush1.bf16.msra.mxu1 %v3573_v23 }
 0x16c   :  { %2378 = vmatprep.subr.bf16.mxu1 %v3578_v6 }
 0x16d   :  { %2270 = vmatpush1.bf16.msra.mxu0 %v3534_v59 }
 0x16e   :  { %2271 = vmatprep.subr.bf16.mxu0 %v3539_v32 }
 0x16f   :  { %1604 = vmatmul.mubr.bf16.gmra.mxu0 %v3979_v26  ;;  %v3548_v26 = vld [vmem:[#allocation9 + $0xe4] ss:$8 sps:$4 sm:$0xff]   ;;  %2379 = vmatpush1.bf16.msra.mxu1 %v3576_v7 }
 0x170   :  { %1717 = vmatmul.mubr.bf16.gmra.mxu1 %v3981_v0  ;;  %1613 = vmatprep.mubr.bf16.mxu0 %v3995_v17  ;;  %v3581_v0 = vld [vmem:[#allocation9 + $0x134] ss:$8 sps:$4 sm:$0xff]   ;;  %v3579_v17 = vld [vmem:[#allocation9 + $0x130] ss:$8 sps:$4 sm:$0xff]  }
 0x171   :  { %1726 = vmatprep.mubr.bf16.mxu1 %v3997_v18  ;;  %2272 = vmatpush1.bf16.msra.mxu0 %v3537_v4  ;;  %v3546_v18 = vld [vmem:[#allocation9 + $0xe0] ss:$8 sps:$4 sm:$0xff]  }
 0x172   :  { %2273 = vmatprep.subr.bf16.mxu0 %v3542_v41  ;;  %2380 = vmatprep.subr.bf16.mxu1 %v3581_v0 }
 0x173   :  { %2381 = vmatpush1.bf16.msra.mxu1 %v3579_v17 }
 0x174   :  { %2382 = vmatprep.subr.bf16.mxu1 %v3584_v8 }
 0x175   :  { %2274 = vmatpush1.bf16.msra.mxu0 %v3540_v24 }
 0x176   :  { %2275 = vmatprep.subr.bf16.mxu0 %v3545_v5 }
 0x177   :  { %1614 = vmatmul.mubr.bf16.gmra.mxu0 %v3999_v20  ;;  %v3554_v20 = vld [vmem:[#allocation9 + $0xc4] ss:$8 sps:$4 sm:$0xff]   ;;  %2383 = vmatpush1.bf16.msra.mxu1 %v3582_v9 }
 0x178   :  { %1727 = vmatmul.mubr.bf16.gmra.mxu1 %v4001_v21  ;;  %1623 = vmatprep.mubr.bf16.mxu0 %v4015_v13  ;;  %v3587_v21 = vld [vmem:[#allocation9 + $0x114] ss:$8 sps:$4 sm:$0xff]   ;;  %v3585_v13 = vld [vmem:[#allocation9 + $0x110] ss:$8 sps:$4 sm:$0xff]  }
 0x179   :  { %1736 = vmatprep.mubr.bf16.mxu1 %v4017_v14  ;;  %2276 = vmatpush2.bf16.msra.mxu0 %v3543_v46  ;;  %v3552_v14 = vld [vmem:[#allocation9 + $0xc0] ss:$8 sps:$4 sm:$0xff]  }
 0x17a   :  { %2277 = vmatprep.subr.bf16.mxu0 %v3548_v26  ;;  %2384 = vmatprep.subr.bf16.mxu1 %v3587_v21 }
 0x17b   :  { %2385 = vmatpush1.bf16.msra.mxu1 %v3585_v13 }
 0x17c   :  { %2386 = vmatprep.subr.bf16.mxu1 %v3590_v47 }
 0x17d   :  { %2278 = vmatpush2.bf16.msra.mxu0 %v3546_v18 }
 0x17e   :  { %2279 = vmatprep.subr.bf16.mxu0 %v3551_v2 }
 0x17f   :  { %1624 = vmatmul.mubr.bf16.gmra.mxu0 %v4019_v25  ;;  %v3560_v25 = vld [vmem:[#allocation9 + $0xa4] ss:$8 sps:$4 sm:$0xff]   ;;  %2387 = vmatpush1.bf16.msra.mxu1 %v3588_v60 }
 0x180   :  { %1737 = vmatmul.mubr.bf16.gmra.mxu1 %v4021_v27  ;;  %1633 = vmatprep.mubr.bf16.mxu0 %v4035_v19  ;;  %v3593_v27 = vld [vmem:[#allocation9 + $0x1f4] ss:$8 sps:$4 sm:$0xff]   ;;  %v3591_v19 = vld [vmem:[#allocation9 + $0x1f0] ss:$8 sps:$4 sm:$0xff]  }
 0x181   :  { %1746 = vmatprep.mubr.bf16.mxu1 %v4037_v43  ;;  %2280 = vmatpush2.bf16.msra.mxu0 %v3549_v10  ;;  %v3558_v43 = vld [vmem:[#allocation9 + $0xa0] ss:$8 sps:$4 sm:$0xff]  }
 0x182   :  { %2281 = vmatprep.subr.bf16.mxu0 %v3554_v20  ;;  %2388 = vmatprep.subr.bf16.mxu1 %v3593_v27 }
 0x183   :  { %2389 = vmatpush2.bf16.msra.mxu1 %v3591_v19 }
 0x184   :  { %2390 = vmatprep.subr.bf16.mxu1 %v3596_v34 }
 0x185   :  { %2282 = vmatpush2.bf16.msra.mxu0 %v3552_v14 }
 0x186   :  { %2283 = vmatprep.subr.bf16.mxu0 %v3557_v28 }
 0x187   :  { %1634 = vmatmul.mubr.bf16.gmra.mxu0 %v4039_v48  ;;  %v3566_v48 = vld [vmem:[#allocation9 + $0x84] ss:$8 sps:$4 sm:$0xff]   ;;  %2391 = vmatpush2.bf16.msra.mxu1 %v3594_v50 }
 0x188   :  { %1747 = vmatmul.mubr.bf16.gmra.mxu1 %v4041_v31  ;;  %1643 = vmatprep.mubr.bf16.mxu0 %v4055_v45  ;;  %v3599_v31 = vld [vmem:[#allocation9 + $0x1d4] ss:$8 sps:$4 sm:$0xff]   ;;  %v3597_v45 = vld [vmem:[#allocation9 + $0x1d0] ss:$8 sps:$4 sm:$0xff]  }
 0x189   :  { %1756 = vmatprep.mubr.bf16.mxu1 %v4057_v29  ;;  %2284 = vmatpush2.bf16.msra.mxu0 %v3555_v44  ;;  %v3564_v29 = vld [vmem:[#allocation9 + $0x80] ss:$8 sps:$4 sm:$0xff]  }
 0x18a   :  { %2285 = vmatprep.subr.bf16.mxu0 %v3560_v25  ;;  %2392 = vmatprep.subr.bf16.mxu1 %v3599_v31 }
 0x18b   :  { %2393 = vmatpush2.bf16.msra.mxu1 %v3597_v45 }
 0x18c   :  { %2394 = vmatprep.subr.bf16.mxu1 %v3602_v52 }
 0x18d   :  { %2286 = vmatpush2.bf16.msra.mxu0 %v3558_v43 }
 0x18e   :  { %2287 = vmatprep.subr.bf16.mxu0 %v3563_v30 }
 0x18f   :  { %1644 = vmatmul.mubr.bf16.gmra.mxu0 %v4059_v22  ;;  %2395 = vmatpush2.bf16.msra.mxu1 %v3600_v53  ;;  %v3608_v22 = vld [vmem:[#allocation9 + $0x1a4] ss:$8 sps:$4 sm:$0xff]  }
 0x190   :  { %1757 = vmatmul.mubr.bf16.gmra.mxu1 %v4061_v49  ;;  %2396 = vmatprep.subr.bf16.mxu1 %v3605_v54  ;;  %v3611_v49 = vld [vmem:[#allocation9 + $0x194] ss:$8 sps:$4 sm:$0xff]  }
 0x191   :  { %2288 = vmatpush2.bf16.msra.mxu0 %v3561_v51 }
 0x192   :  { %2289 = vmatprep.subr.bf16.mxu0 %v3566_v48 }
 0x193   :  { %2397 = vmatpush2.bf16.msra.mxu1 %v3603_v55 }
 0x194   :  { %2398 = vmatprep.subr.bf16.mxu1 %v3608_v22 }
 0x195   :  { %2290 = vmatpush2.bf16.msra.mxu0 %v3564_v29 }
 0x197   :  { %2399 = vmatpush2.bf16.msra.mxu1 %v3606_v57 }
 0x198   :  { %2400 = vmatprep.subr.bf16.mxu1 %v3611_v49 }
 0x19b   :  { %2401 = vmatpush2.bf16.msra.mxu1 %v3609_v11 }
 0x19c   :  { %2402 = vmatprep.subr.bf16.mxu1 %v3614_v63 }
 0x19f   :  { %2403 = vmatpush2.bf16.msra.mxu1 %v3612_v12 }
 0x1d7   :  { %v1349_v56 = vpop.f32.mrf.mxu0 }
 0x1d8   :  { %v1462_v62 = vpop.f32.mrf.mxu1  ;;  %v1350_v32 = vadd.f32 %v1349_v56, %v4110_v16 }
 0x1d9   :  { %v1351_v61 = vpop.f32.mrf.mxu0 }
 0x1da   :  { %v1464_v58 = vpop.f32.mrf.mxu1  ;;  %v1352_v59 = vadd.f32 %v1351_v61, %v4106_v15  ;;  %v1463_v6 = vadd.f32 %v1462_v62, %v1350_v32 }
 0x1db   :  { %v1353_v33 = vpop.f32.mrf.mxu0 }
 0x1dc   :  { %v1466_v3 = vpop.f32.mrf.mxu1  ;;  %v1354_v4 = vadd.f32 %v1353_v33, %v4110_v16  ;;  %v1465_v23 = vadd.f32 %v1464_v58, %v1352_v59  ;;  %v1767_v10 = vmax.f32 %v1463_v6, 0.0 }
 0x1dd   :  { %v1355_v41 = vpop.f32.mrf.mxu0 }
 0x1de   :  { %v1468_v42 = vpop.f32.mrf.mxu1  ;;  %v1467_v24 = vadd.f32 %v1466_v3, %v1354_v4  ;;  %v1356_v5 = vadd.f32 %v1355_v41, %v4106_v15  ;;  %v1768_v18 = vmax.f32 %v1465_v23, 0.0 }
 0x1df   :  { %v1359_v7 = vpop.f32.mrf.mxu0 }
 0x1e0   :  { %v1469_v46 = vadd.f32 %v1468_v42, %v1356_v5  ;;  %v1472_v26 = vpop.f32.mrf.mxu1  ;;  %v1771_v0 = vmax.f32 %v1467_v24, 0.0  ;;  %v1360_v20 = vadd.f32 %v1359_v7, %v4110_v16 }
 0x1e1   :  { %v1361_v17 = vpop.f32.mrf.mxu0 }
 0x1e2   :  { %v1772_v2 = vmax.f32 %v1469_v46, 0.0  ;;  %v1362_v8 = vadd.f32 %v1361_v17, %v4106_v15  ;;  %v1474_v9 = vpop.f32.mrf.mxu1  ;;  %v1831_v47 = vpack.c.bf16 %v1771_v0, %v1767_v10  ;;  %v1473_v43 = vadd.f32 %v1472_v26, %v1360_v20 }
 0x1e3   :  { %v1363_v21 = vpop.f32.mrf.mxu0 }
 0x1e4   :  { %v1832_v13 = vpack.c.bf16 %v1772_v2, %v1768_v18  ;;  %v1364_v14 = vadd.f32 %v1363_v21, %v4110_v16  ;;  %v1476_v28 = vpop.f32.mrf.mxu1  ;;  %v1475_v44 = vadd.f32 %v1474_v9, %v1362_v8  ;;  %v1775_v53 = vmax.f32 %v1473_v43, 0.0 }
 0x1e5   :  { %v1365_v60 = vpop.f32.mrf.mxu0 }
 0x1e6   :  { %v1477_v25 = vadd.f32 %v1476_v28, %v1364_v14  ;;  %v1366_v27 = vadd.f32 %v1365_v60, %v4106_v15  ;;  %v1478_v19 = vpop.f32.mrf.mxu1  ;;  %2291 = vmatprep.mubr.bf16.mxu0 %v1832_v13  ;;  %v1776_v31 = vmax.f32 %v1475_v44, 0.0 }
 0x1e7   :  { %v1369_v30 = vpop.f32.mrf.mxu0  ;;  %2292 = vmatmul.mubr.bf16.vlgmr.msra.gmra.mxu0 %v1831_v47 }
 0x1e8   :  { %v1479_v34 = vadd.f32 %v1478_v19, %v1366_v27  ;;  %v1482_v50 = vpop.f32.mrf.mxu1  ;;  %v1779_v51 = vmax.f32 %v1477_v25, 0.0  ;;  %v1370_v54 = vadd.f32 %v1369_v30, %v4110_v16 }
 0x1e9   :  { %v1371_v48 = vpop.f32.mrf.mxu0 }
 0x1ea   :  { %v1780_v45 = vmax.f32 %v1479_v34, 0.0  ;;  %v1372_v29 = vadd.f32 %v1371_v48, %v4106_v15  ;;  %v1484_v52 = vpop.f32.mrf.mxu1  ;;  %v1835_v11 = vpack.c.bf16 %v1779_v51, %v1775_v53  ;;  %v1483_v58 = vadd.f32 %v1482_v50, %v1370_v54 }
 0x1eb   :  { %v1373_v55 = vpop.f32.mrf.mxu0 }
 0x1ec   :  { %v1836_v22 = vpack.c.bf16 %v1780_v45, %v1776_v31  ;;  %v1374_v57 = vadd.f32 %v1373_v55, %v4110_v16  ;;  %v1486_v49 = vpop.f32.mrf.mxu1  ;;  %v1485_v12 = vadd.f32 %v1484_v52, %v1372_v29  ;;  %v1783_v5 = vmax.f32 %v1483_v58, 0.0 }
 0x1ed   :  { %v1375_v63 = vpop.f32.mrf.mxu0 }
 0x1ee   :  { %v1487_v56 = vadd.f32 %v1486_v49, %v1374_v57  ;;  %v1376_v62 = vadd.f32 %v1375_v63, %v4106_v15  ;;  %v1488_v61 = vpop.f32.mrf.mxu1  ;;  %2301 = vmatprep.mubr.bf16.mxu0 %v1836_v22  ;;  %v1784_v41 = vmax.f32 %v1485_v12, 0.0 }
 0x1ef   :  { %v1379_v59 = vpop.f32.mrf.mxu0  ;;  %2302 = vmatmul.mubr.bf16.gmra.mxu0 %v1835_v11 }
 0x1f0   :  { %v1489_v32 = vadd.f32 %v1488_v61, %v1376_v62  ;;  %v1492_v33 = vpop.f32.mrf.mxu1  ;;  %v1787_v3 = vmax.f32 %v1487_v56, 0.0  ;;  %v1380_v6 = vadd.f32 %v1379_v59, %v4110_v16 }
 0x1f1   :  { %v1381_v4 = vpop.f32.mrf.mxu0 }
 0x1f2   :  { %v1788_v42 = vmax.f32 %v1489_v32, 0.0  ;;  %v1382_v23 = vadd.f32 %v1381_v4, %v4106_v15  ;;  %v1494_v24 = vpop.f32.mrf.mxu1  ;;  %v1839_v17 = vpack.c.bf16 %v1787_v3, %v1783_v5  ;;  %v1493_v20 = vadd.f32 %v1492_v33, %v1380_v6 }
 0x1f3   :  { %v1383_v7 = vpop.f32.mrf.mxu0 }
 0x1f4   :  { %v1840_v46 = vpack.c.bf16 %v1788_v42, %v1784_v41  ;;  %v1384_v26 = vadd.f32 %v1383_v7, %v4110_v16  ;;  %v1496_v0 = vpop.f32.mrf.mxu1  ;;  %v1495_v2 = vadd.f32 %v1494_v24, %v1382_v23  ;;  %v1791_v19 = vmax.f32 %v1493_v20, 0.0 }
 0x1f5   :  { %v1385_v18 = vpop.f32.mrf.mxu0 }
 0x1f6   :  { %v1497_v8 = vadd.f32 %v1496_v0, %v1384_v26  ;;  %v1386_v9 = vadd.f32 %v1385_v18, %v4106_v15  ;;  %v1498_v10 = vpop.f32.mrf.mxu1  ;;  %2311 = vmatprep.mubr.bf16.mxu0 %v1840_v46  ;;  %v1792_v60 = vmax.f32 %v1495_v2, 0.0 }
 0x1f7   :  { %v1389_v21 = vpop.f32.mrf.mxu0  ;;  %2312 = vmatmul.mubr.bf16.gmra.mxu0 %v1839_v17 }
 0x1f8   :  { %v1499_v13 = vadd.f32 %v1498_v10, %v1386_v9  ;;  %v1502_v14 = vpop.f32.mrf.mxu1  ;;  %v1795_v28 = vmax.f32 %v1497_v8, 0.0  ;;  %v1390_v43 = vadd.f32 %v1389_v21, %v4110_v16 }
 0x1f9   :  { %v1391_v47 = vpop.f32.mrf.mxu0 }
 0x1fa   :  { %v1796_v44 = vmax.f32 %v1499_v13, 0.0  ;;  %v1392_v25 = vadd.f32 %v1391_v47, %v4106_v15  ;;  %v1504_v27 = vpop.f32.mrf.mxu1  ;;  %v1843_v48 = vpack.c.bf16 %v1795_v28, %v1791_v19  ;;  %v1503_v54 = vadd.f32 %v1502_v14, %v1390_v43 }
 0x1fb   :  { %v1393_v30 = vpop.f32.mrf.mxu0 }
 0x1fc   :  { %v1844_v34 = vpack.c.bf16 %v1796_v44, %v1792_v60  ;;  %v1394_v50 = vadd.f32 %v1393_v30, %v4110_v16  ;;  %v1506_v51 = vpop.f32.mrf.mxu1  ;;  %v1505_v45 = vadd.f32 %v1504_v27, %v1392_v25  ;;  %v1799_v61 = vmax.f32 %v1503_v54, 0.0 }
 0x1fd   :  { %v1395_v31 = vpop.f32.mrf.mxu0 }
 0x1fe   :  { %v1507_v29 = vadd.f32 %v1506_v51, %v1394_v50  ;;  %v1396_v52 = vadd.f32 %v1395_v31, %v4106_v15  ;;  %v1508_v53 = vpop.f32.mrf.mxu1  ;;  %2321 = vmatprep.mubr.bf16.mxu0 %v1844_v34  ;;  %v1800_v63 = vmax.f32 %v1505_v45, 0.0 }
 0x1ff   :  { %v1399_v55 = vpop.f32.mrf.mxu0  ;;  %2322 = vmatmul.mubr.bf16.gmra.mxu0 %v1843_v48 }
 0x200   :  { %v1509_v22 = vadd.f32 %v1508_v53, %v1396_v52  ;;  %v1512_v57 = vpop.f32.mrf.mxu1  ;;  %v1803_v49 = vmax.f32 %v1507_v29, 0.0  ;;  %v1400_v58 = vadd.f32 %v1399_v55, %v4110_v16 }
 0x201   :  { %v1401_v11 = vpop.f32.mrf.mxu0 }
 0x202   :  { %v1804_v12 = vmax.f32 %v1509_v22, 0.0  ;;  %v1402_v56 = vadd.f32 %v1401_v11, %v4106_v15  ;;  %v1514_v62 = vpop.f32.mrf.mxu1  ;;  %v1847_v4 = vpack.c.bf16 %v1803_v49, %v1799_v61  ;;  %v1513_v6 = vadd.f32 %v1512_v57, %v1400_v58 }
 0x203   :  { %v1403_v59 = vpop.f32.mrf.mxu0  ;;  %v4147_v58 = vrot.slane %v4102_v1, %v149_v38 }
 0x204   :  { %v1848_v32 = vpack.c.bf16 %v1804_v12, %v1800_v63  ;;  %v1404_v33 = vadd.f32 %v1403_v59, %v4110_v16  ;;  %v1516_v3 = vpop.f32.mrf.mxu1  ;;  %v1515_v42 = vadd.f32 %v1514_v62, %v1402_v56  ;;  %v1807_v10 = vmax.f32 %v1513_v6, 0.0 }
 0x205   :  { %v1405_v41 = vpop.f32.mrf.mxu0 }
 0x206   :  { %v1517_v23 = vadd.f32 %v1516_v3, %v1404_v33  ;;  %v1406_v24 = vadd.f32 %v1405_v41, %v4106_v15  ;;  %v1518_v5 = vpop.f32.mrf.mxu1  ;;  %2331 = vmatprep.mubr.bf16.mxu0 %v1848_v32  ;;  %v1808_v18 = vmax.f32 %v1515_v42, 0.0  ;;  %v4152_v32 = vrot.slane %v4102_v1, %v145_v40 }
 0x207   :  { %v1409_v7 = vpop.f32.mrf.mxu0  ;;  %2332 = vmatmul.mubr.bf16.gmra.mxu0 %v1847_v4 }
 0x208   :  { %v1519_v46 = vadd.f32 %v1518_v5, %v1406_v24  ;;  %v1522_v26 = vpop.f32.mrf.mxu1  ;;  %v1811_v0 = vmax.f32 %v1517_v23, 0.0  ;;  %v1410_v20 = vadd.f32 %v1409_v7, %v4110_v16 }
 0x209   :  { %v1411_v17 = vpop.f32.mrf.mxu0 }
 0x20a   :  { %v1812_v2 = vmax.f32 %v1519_v46, 0.0  ;;  %v1412_v8 = vadd.f32 %v1411_v17, %v4106_v15  ;;  %v1524_v9 = vpop.f32.mrf.mxu1  ;;  %v1851_v47 = vpack.c.bf16 %v1811_v0, %v1807_v10  ;;  %v1523_v43 = vadd.f32 %v1522_v26, %v1410_v20 }
 0x20b   :  { %v1413_v21 = vpop.f32.mrf.mxu0 }
 0x20c   :  { %v1852_v13 = vpack.c.bf16 %v1812_v2, %v1808_v18  ;;  %v1414_v14 = vadd.f32 %v1413_v21, %v4110_v16  ;;  %v1526_v28 = vpop.f32.mrf.mxu1  ;;  %v1525_v44 = vadd.f32 %v1524_v9, %v1412_v8  ;;  %v1815_v53 = vmax.f32 %v1523_v43, 0.0 }
 0x20d   :  { %v1415_v60 = vpop.f32.mrf.mxu0 }
 0x20e   :  { %v1527_v25 = vadd.f32 %v1526_v28, %v1414_v14  ;;  %v1416_v27 = vadd.f32 %v1415_v60, %v4106_v15  ;;  %v1528_v19 = vpop.f32.mrf.mxu1  ;;  %2341 = vmatprep.mubr.bf16.mxu0 %v1852_v13  ;;  %v1816_v31 = vmax.f32 %v1525_v44, 0.0 }
 0x20f   :  { %v1419_v30 = vpop.f32.mrf.mxu0  ;;  %2342 = vmatmul.mubr.bf16.gmra.mxu0 %v1851_v47 }
 0x210   :  { %v1529_v34 = vadd.f32 %v1528_v19, %v1416_v27  ;;  %v1532_v50 = vpop.f32.mrf.mxu1  ;;  %v1819_v51 = vmax.f32 %v1527_v25, 0.0  ;;  %v1420_v54 = vadd.f32 %v1419_v30, %v4110_v16 }
 0x211   :  { %v1421_v48 = vpop.f32.mrf.mxu0 }
 0x212   :  { %v1820_v45 = vmax.f32 %v1529_v34, 0.0  ;;  %v1422_v29 = vadd.f32 %v1421_v48, %v4106_v15  ;;  %v1534_v52 = vpop.f32.mrf.mxu1  ;;  %v1855_v11 = vpack.c.bf16 %v1819_v51, %v1815_v53  ;;  %v1533_v59 = vadd.f32 %v1532_v50, %v1420_v54 }
 0x213   :  { %v1423_v55 = vpop.f32.mrf.mxu0 }
 0x214   :  { %v1856_v22 = vpack.c.bf16 %v1820_v45, %v1816_v31  ;;  %v1424_v57 = vadd.f32 %v1423_v55, %v4110_v16  ;;  %v1536_v49 = vpop.f32.mrf.mxu1  ;;  %v1535_v12 = vadd.f32 %v1534_v52, %v1422_v29  ;;  %v1823_v5 = vmax.f32 %v1533_v59, 0.0 }
 0x215   :  { %v1425_v63 = vpop.f32.mrf.mxu0 }
 0x216   :  { %v1537_v56 = vadd.f32 %v1536_v49, %v1424_v57  ;;  %v1426_v62 = vadd.f32 %v1425_v63, %v4106_v15  ;;  %v1538_v61 = vpop.f32.mrf.mxu1  ;;  %2351 = vmatprep.mubr.bf16.mxu0 %v1856_v22  ;;  %v1824_v15 = vmax.f32 %v1535_v12, 0.0 }
 0x217   :  { %v1575_v16 = vpop.f32.mrf.mxu0  ;;  %2352 = vmatmul.mubr.bf16.gmra.mxu0 %v1855_v11 }
 0x218   :  { %v1539_v33 = vadd.f32 %v1538_v61, %v1426_v62  ;;  %v1688_v3 = vpop.f32.mrf.mxu1  ;;  %v1827_v4 = vmax.f32 %v1537_v56, 0.0  ;;  %v1576_v38 = vadd.f32 %v1575_v16, %v4152_v32 }
 0x219   :  { %v1577_v41 = vpop.f32.mrf.mxu0 }
 0x21a   :  { %v1828_v42 = vmax.f32 %v1539_v33, 0.0  ;;  %v1578_v23 = vadd.f32 %v1577_v41, %v4147_v58  ;;  %v1690_v24 = vpop.f32.mrf.mxu1  ;;  %v1859_v1 = vpack.c.bf16 %v1827_v4, %v1823_v5  ;;  %v1689_v8 = vadd.f32 %v1688_v3, %v1576_v38 }
 0x21b   :  { %v1579_v6 = vpop.f32.mrf.mxu0 }
 0x21c   :  { %v1860_v7 = vpack.c.bf16 %v1828_v42, %v1824_v15  ;;  %v1580_v46 = vadd.f32 %v1579_v6, %v4152_v32  ;;  %v1692_v40 = vpop.f32.mrf.mxu1  ;;  %v1691_v0 = vadd.f32 %v1690_v24, %v1578_v23  ;;  %v1769_v44 = vmax.f32 %v1689_v8, 0.0 }
 0x21d   :  { %v1581_v26 = vpop.f32.mrf.mxu0 }
 0x21e   :  { %v1693_v17 = vadd.f32 %v1692_v40, %v1580_v46  ;;  %v1582_v18 = vadd.f32 %v1581_v26, %v4147_v58  ;;  %v1694_v2 = vpop.f32.mrf.mxu1  ;;  %2361 = vmatprep.mubr.bf16.mxu0 %v1860_v7  ;;  %v1770_v14 = vmax.f32 %v1691_v0, 0.0 }
 0x21f   :  { %v1585_v9 = vpop.f32.mrf.mxu0  ;;  %2362 = vmatmul.mubr.bf16.gmra.mxu0 %v1859_v1 }
 0x220   :  { %v1695_v10 = vadd.f32 %v1694_v2, %v1582_v18  ;;  %v1698_v20 = vpop.f32.mrf.mxu1  ;;  %v1773_v21 = vmax.f32 %v1693_v17, 0.0  ;;  %v1586_v25 = vadd.f32 %v1585_v9, %v4152_v32 }
 0x221   :  { %v1587_v13 = vpop.f32.mrf.mxu0 }
 0x222   :  { %v1774_v28 = vmax.f32 %v1695_v10, 0.0  ;;  %v1588_v47 = vadd.f32 %v1587_v13, %v4147_v58  ;;  %v1700_v60 = vpop.f32.mrf.mxu1  ;;  %v1833_v34 = vpack.c.bf16 %v1773_v21, %v1769_v44  ;;  %v1699_v29 = vadd.f32 %v1698_v20, %v1586_v25 }
 0x223   :  { %v1589_v27 = vpop.f32.mrf.mxu0 }
 0x224   :  { %v1834_v19 = vpack.c.bf16 %v1774_v28, %v1770_v14  ;;  %v1590_v43 = vadd.f32 %v1589_v27, %v4152_v32  ;;  %v1702_v30 = vpop.f32.mrf.mxu1  ;;  %v1701_v51 = vadd.f32 %v1700_v60, %v1588_v47  ;;  %v1777_v12 = vmax.f32 %v1699_v29, 0.0 }
 0x225   :  { %v1591_v50 = vpop.f32.mrf.mxu0 }
 0x226   :  { %v1703_v48 = vadd.f32 %v1702_v30, %v1590_v43  ;;  %v1592_v31 = vadd.f32 %v1591_v50, %v4147_v58  ;;  %v1704_v45 = vpop.f32.mrf.mxu1  ;;  %2404 = vmatprep.mubr.bf16.mxu1 %v1834_v19  ;;  %v1778_v57 = vmax.f32 %v1701_v51, 0.0 }
 0x227   :  { %v1595_v52 = vpop.f32.mrf.mxu0  ;;  %2405 = vmatmul.mubr.bf16.vlgmr.msra.gmra.mxu1 %v1833_v34 }
 0x228   :  { %v1705_v53 = vadd.f32 %v1704_v45, %v1592_v31  ;;  %v1708_v54 = vpop.f32.mrf.mxu1  ;;  %v1781_v55 = vmax.f32 %v1703_v48, 0.0  ;;  %v1596_v56 = vadd.f32 %v1595_v52, %v4152_v32 }
 0x229   :  { %v1597_v22 = vpop.f32.mrf.mxu0 }
 0x22a   :  { %v1782_v49 = vmax.f32 %v1705_v53, 0.0  ;;  %v1598_v11 = vadd.f32 %v1597_v22, %v4147_v58  ;;  %v1710_v63 = vpop.f32.mrf.mxu1  ;;  %v1837_v33 = vpack.c.bf16 %v1781_v55, %v1777_v12  ;;  %v1709_v23 = vadd.f32 %v1708_v54, %v1596_v56 }
 0x22b   :  { %v1599_v62 = vpop.f32.mrf.mxu0 }
 0x22c   :  { %v1838_v61 = vpack.c.bf16 %v1782_v49, %v1778_v57  ;;  %v1600_v59 = vadd.f32 %v1599_v62, %v4152_v32  ;;  %v1712_v16 = vpop.f32.mrf.mxu1  ;;  %v1711_v4 = vadd.f32 %v1710_v63, %v1598_v11  ;;  %v1785_v0 = vmax.f32 %v1709_v23, 0.0 }
 0x22d   :  { %v1601_v3 = vpop.f32.mrf.mxu0 }
 0x22e   :  { %v1713_v41 = vadd.f32 %v1712_v16, %v1600_v59  ;;  %v1602_v15 = vadd.f32 %v1601_v3, %v4147_v58  ;;  %v1714_v42 = vpop.f32.mrf.mxu1  ;;  %2414 = vmatprep.mubr.bf16.mxu1 %v1838_v61  ;;  %v1786_v46 = vmax.f32 %v1711_v4, 0.0 }
 0x22f   :  { %v1605_v24 = vpop.f32.mrf.mxu0  ;;  %2415 = vmatmul.mubr.bf16.gmra.mxu1 %v1837_v33 }
 0x230   :  { %v1715_v5 = vadd.f32 %v1714_v42, %v1602_v15  ;;  %v1718_v38 = vpop.f32.mrf.mxu1  ;;  %v1789_v6 = vmax.f32 %v1713_v41, 0.0  ;;  %v1606_v17 = vadd.f32 %v1605_v24, %v4152_v32 }
 0x231   :  { %v1607_v7 = vpop.f32.mrf.mxu0 }
 0x232   :  { %v1790_v40 = vmax.f32 %v1715_v5, 0.0  ;;  %v1608_v1 = vadd.f32 %v1607_v7, %v4147_v58  ;;  %v1720_v26 = vpop.f32.mrf.mxu1  ;;  %v1841_v10 = vpack.c.bf16 %v1789_v6, %v1785_v0  ;;  %v1719_v47 = vadd.f32 %v1718_v38, %v1606_v17  ;;  %v3615_v5 = vld [vmem:[#allocation11 + $0x78] sm:$0xff]  }
 0x233   :  { %v1609_v18 = vpop.f32.mrf.mxu0  ;;  %3230 = vmatprep.subr.bf16.mxu0 %v3615_v5  ;;  %3294 = vmatprep.subr.bf16.mxu1 %v3615_v5 }
 0x234   :  { %v1842_v2 = vpack.c.bf16 %v1790_v40, %v1786_v46  ;;  %v1610_v8 = vadd.f32 %v1609_v18, %v4152_v32  ;;  %v1722_v9 = vpop.f32.mrf.mxu1  ;;  %v1721_v21 = vadd.f32 %v1720_v26, %v1608_v1  ;;  %v1793_v51 = vmax.f32 %v1719_v47, 0.0  ;;  %v3616_v26 = vld [vmem:[#allocation11 + $0x38] sm:$0xff]  }
 0x235   :  { %v1611_v20 = vpop.f32.mrf.mxu0  ;;  %3231 = vmatpush3.bf16.msra.mxu0 %v3616_v26  ;;  %3302 = vmatpush3.bf16.msra.mxu1 %v3616_v26  ;;  %v3624_v26 = vld [vmem:[#allocation11 + $0x18] sm:$0xff]  }
 0x236   :  { %v1723_v13 = vadd.f32 %v1722_v9, %v1610_v8  ;;  %v1612_v14 = vadd.f32 %v1611_v20, %v4147_v58  ;;  %v1724_v28 = vpop.f32.mrf.mxu1  ;;  %2424 = vmatprep.mubr.bf16.mxu1 %v1842_v2  ;;  %v1794_v43 = vmax.f32 %v1721_v21, 0.0 }
 0x237   :  { %v1615_v60 = vpop.f32.mrf.mxu0  ;;  %2425 = vmatmul.mubr.bf16.gmra.mxu1 %v1841_v10 }
 0x238   :  { %v1725_v44 = vadd.f32 %v1724_v28, %v1612_v14  ;;  %v1728_v25 = vpop.f32.mrf.mxu1  ;;  %v1797_v27 = vmax.f32 %v1723_v13, 0.0  ;;  %v1616_v48 = vadd.f32 %v1615_v60, %v4152_v32 }
 0x239   :  { %v1617_v19 = vpop.f32.mrf.mxu0 }
 0x23a   :  { %v1798_v30 = vmax.f32 %v1725_v44, 0.0  ;;  %v1618_v34 = vadd.f32 %v1617_v19, %v4147_v58  ;;  %v1730_v50 = vpop.f32.mrf.mxu1  ;;  %v1845_v53 = vpack.c.bf16 %v1797_v27, %v1793_v51  ;;  %v1729_v11 = vadd.f32 %v1728_v25, %v1616_v48  ;;  %v3617_v27 = vld [vmem:[#allocation11 + $0x70] sm:$0xff]  }
 0x23b   :  { %v1619_v31 = vpop.f32.mrf.mxu0  ;;  %3232 = vmatprep.subr.bf16.mxu0 %v3617_v27  ;;  %v3618_v48 = vld [vmem:[#allocation11 + $0x30] sm:$0xff]   ;;  %3295 = vmatprep.subr.bf16.mxu1 %v3617_v27 }
 0x23c   :  { %v1846_v45 = vpack.c.bf16 %v1798_v30, %v1794_v43  ;;  %v1620_v29 = vadd.f32 %v1619_v31, %v4152_v32  ;;  %v1732_v52 = vpop.f32.mrf.mxu1  ;;  %v1731_v55 = vadd.f32 %v1730_v50, %v1618_v34  ;;  %v1801_v4 = vmax.f32 %v1729_v11, 0.0  ;;  %3233 = vmatpush3.bf16.msra.mxu0 %v3618_v48  ;;  %3303 = vmatpush3.bf16.msra.mxu1 %v3618_v48 }
 0x23d   :  { %v1621_v54 = vpop.f32.mrf.mxu0 }
 0x23e   :  { %v1733_v22 = vadd.f32 %v1732_v52, %v1620_v29  ;;  %v1622_v57 = vadd.f32 %v1621_v54, %v4147_v58  ;;  %v1734_v49 = vpop.f32.mrf.mxu1  ;;  %2434 = vmatprep.mubr.bf16.mxu1 %v1846_v45  ;;  %v1802_v59 = vmax.f32 %v1731_v55, 0.0 }
 0x23f   :  { %v1625_v63 = vpop.f32.mrf.mxu0  ;;  %2435 = vmatmul.mubr.bf16.gmra.mxu1 %v1845_v53 }
 0x240   :  { %v1735_v12 = vadd.f32 %v1734_v49, %v1622_v57  ;;  %v1738_v56 = vpop.f32.mrf.mxu1  ;;  %v1805_v62 = vmax.f32 %v1733_v22, 0.0  ;;  %v1626_v41 = vadd.f32 %v1625_v63, %v4152_v32 }
 0x241   :  { %v1627_v61 = vpop.f32.mrf.mxu0 }
 0x242   :  { %v1806_v16 = vmax.f32 %v1735_v12, 0.0  ;;  %v1628_v33 = vadd.f32 %v1627_v61, %v4147_v58  ;;  %v1740_v3 = vpop.f32.mrf.mxu1  ;;  %v1849_v38 = vpack.c.bf16 %v1805_v62, %v1801_v4  ;;  %v1739_v0 = vadd.f32 %v1738_v56, %v1626_v41 }
 0x243   :  { %v1629_v15 = vpop.f32.mrf.mxu0 }
 0x244   :  { %v1850_v42 = vpack.c.bf16 %v1806_v16, %v1802_v59  ;;  %v1630_v23 = vadd.f32 %v1629_v15, %v4152_v32  ;;  %v1742_v24 = vpop.f32.mrf.mxu1  ;;  %v1741_v7 = vadd.f32 %v1740_v3, %v1628_v33  ;;  %v1809_v14 = vmax.f32 %v1739_v0, 0.0  ;;  %v3619_v59 = vld [vmem:[#allocation11 + $0x68] sm:$0xff]   ;;  %v3625_v0 = vld [vmem:[#allocation11 + $0x50] sm:$0xff]  }
 0x245   :  { %v1631_v6 = vpop.f32.mrf.mxu0  ;;  %3234 = vmatprep.subr.bf16.mxu0 %v3619_v59  ;;  %v3620_v15 = vld [vmem:[#allocation11 + $0x28] sm:$0xff]   ;;  %3296 = vmatprep.subr.bf16.mxu1 %v3619_v59 }
 0x246   :  { %v1743_v46 = vadd.f32 %v1742_v24, %v1630_v23  ;;  %v1632_v40 = vadd.f32 %v1631_v6, %v4147_v58  ;;  %v1744_v1 = vpop.f32.mrf.mxu1  ;;  %2444 = vmatprep.mubr.bf16.mxu1 %v1850_v42  ;;  %v1810_v10 = vmax.f32 %v1741_v7, 0.0  ;;  %3235 = vmatpush3.bf16.msra.mxu0 %v3620_v15 }
 0x247   :  { %v1635_v17 = vpop.f32.mrf.mxu0  ;;  %2445 = vmatmul.mubr.bf16.gmra.mxu1 %v1849_v38 }
 0x248   :  { %v1745_v18 = vadd.f32 %v1744_v1, %v1632_v40  ;;  %v1748_v2 = vpop.f32.mrf.mxu1  ;;  %v1813_v8 = vmax.f32 %v1743_v46, 0.0  ;;  %v1636_v28 = vadd.f32 %v1635_v17, %v4152_v32  ;;  %3304 = vmatpush3.bf16.msra.mxu1 %v3620_v15  ;;  %v3621_v46 = vld [vmem:[#allocation11 + $0x60] sm:$0xff]   ;;  %v3623_v1 = vld [vmem:[#allocation11 + $0x58] sm:$0xff]   ;;  %v3626_v17 = vld [vmem:[#allocation11 + $0x10] sm:$0xff]  }
 0x249   :  { %v1637_v9 = vpop.f32.mrf.mxu0  ;;  %3236 = vmatprep.subr.bf16.mxu0 %v3621_v46  ;;  %3297 = vmatprep.subr.bf16.mxu1 %v3621_v46 }
 0x24a   :  { %v1814_v20 = vmax.f32 %v1745_v18, 0.0  ;;  %v1638_v21 = vadd.f32 %v1637_v9, %v4147_v58  ;;  %v1750_v13 = vpop.f32.mrf.mxu1  ;;  %v1853_v19 = vpack.c.bf16 %v1813_v8, %v1809_v14  ;;  %v1749_v31 = vadd.f32 %v1748_v2, %v1636_v28  ;;  %v3627_v18 = vld [vmem:[#allocation11 + $0x48] sm:$0xff]   ;;  %v3629_v8 = vld [vmem:[#allocation11 + $0x40] sm:$0xff]  }
 0x24b   :  { %v1639_v47 = vpop.f32.mrf.mxu0  ;;  %v3628_v2 = vld [vmem:[#allocation11 + $0x8] sm:$0xff]   ;;  %v3630_v9 = vld [vmem:[#allocation11] sm:$0xff]  }
 0x24c   :  { %v1854_v60 = vpack.c.bf16 %v1814_v20, %v1810_v10  ;;  %v1640_v44 = vadd.f32 %v1639_v47, %v4152_v32  ;;  %v1752_v25 = vpop.f32.mrf.mxu1  ;;  %v1751_v30 = vadd.f32 %v1750_v13, %v1638_v21  ;;  %v1817_v11 = vmax.f32 %v1749_v31, 0.0 }
 0x24d   :  { %v1641_v43 = vpop.f32.mrf.mxu0 }
 0x24e   :  { %v1753_v34 = vadd.f32 %v1752_v25, %v1640_v44  ;;  %v1642_v50 = vadd.f32 %v1641_v43, %v4147_v58  ;;  %v1754_v51 = vpop.f32.mrf.mxu1  ;;  %2454 = vmatprep.mubr.bf16.mxu1 %v1854_v60  ;;  %v1818_v55 = vmax.f32 %v1751_v30, 0.0 }
 0x24f   :  { %v1645_v45 = vpop.f32.mrf.mxu0  ;;  %2455 = vmatmul.mubr.bf16.gmra.mxu1 %v1853_v19 }
 0x250   :  { %v1755_v29 = vadd.f32 %v1754_v51, %v1642_v50  ;;  %v1758_v52 = vpop.f32.mrf.mxu1  ;;  %v1821_v53 = vmax.f32 %v1753_v34, 0.0  ;;  %v1646_v63 = vadd.f32 %v1645_v45, %v4152_v32  ;;  %v1927_v51 = vld [vmem:[%s4373_s6] sm:$0x3] }
 0x251   :  { %v1647_v54 = vpop.f32.mrf.mxu0  ;;  %v4200_v31 = vrot.slane %v1927_v51, %v3883_v37  ;;  %v4203_v45 = vrot.slane %v1927_v51, %v3887_v39 }
 0x252   :  { %v1822_v22 = vmax.f32 %v1755_v29, 0.0  ;;  %v1648_v57 = vadd.f32 %v1647_v54, %v4147_v58  ;;  %v1760_v49 = vpop.f32.mrf.mxu1  ;;  %v1857_v16 = vpack.c.bf16 %v1821_v53, %v1817_v11  ;;  %v1759_v42 = vadd.f32 %v1758_v52, %v1646_v63 }
 0x253   :  { %v1649_v12 = vpop.f32.mrf.mxu0 }
 0x254   :  { %v1858_v56 = vpack.c.bf16 %v1822_v22, %v1818_v55  ;;  %v1650_v62 = vadd.f32 %v1649_v12, %v4152_v32  ;;  %v1762_v61 = vpop.f32.mrf.mxu1  ;;  %v1761_v3 = vadd.f32 %v1760_v49, %v1648_v57  ;;  %v1825_v6 = vmax.f32 %v1759_v42, 0.0 }
 0x255   :  { %v1651_v33 = vpop.f32.mrf.mxu0 }
 0x256   :  { %v1763_v4 = vadd.f32 %v1762_v61, %v1650_v62  ;;  %v1652_v41 = vadd.f32 %v1651_v33, %v4147_v58  ;;  %2464 = vmatprep.mubr.bf16.mxu1 %v1858_v56  ;;  %v1764_v23 = vpop.f32.mrf.mxu1  ;;  %v1826_v32 = vmax.f32 %v1761_v3, 0.0  ;;  %v3622_v58 = vld [vmem:[#allocation11 + $0x20] sm:$0xff]  }
 0x257   :  { %2465 = vmatmul.mubr.bf16.gmra.mxu1 %v1857_v16  ;;  %3237 = vmatpush3.bf16.msra.mxu0 %v3622_v58 }
 0x258   :  { %v1765_v24 = vadd.f32 %v1764_v23, %v1652_v41  ;;  %v1829_v5 = vmax.f32 %v1763_v4, 0.0  ;;  %3305 = vmatpush3.bf16.msra.mxu1 %v3622_v58  ;;  %3238 = vmatprep.subr.bf16.mxu0 %v3623_v1 }
 0x259   :  { %3298 = vmatprep.subr.bf16.mxu1 %v3623_v1 }
 0x25a   :  { %v1830_v38 = vmax.f32 %v1765_v24, 0.0  ;;  %v1861_v40 = vpack.c.bf16 %v1829_v5, %v1825_v6 }
 0x25b   :  { %3239 = vmatpush3.bf16.msra.mxu0 %v3624_v26 }
 0x25c   :  { %v1862_v7 = vpack.c.bf16 %v1830_v38, %v1826_v32  ;;  %3306 = vmatpush3.bf16.msra.mxu1 %v3624_v26  ;;  %3240 = vmatprep.subr.bf16.mxu0 %v3625_v0 }
 0x25d   :  { %3299 = vmatprep.subr.bf16.mxu1 %v3625_v0 }
 0x25e   :  { %2474 = vmatprep.mubr.bf16.mxu1 %v1862_v7 }
 0x25f   :  { %2475 = vmatmul.mubr.bf16.gmra.mxu1 %v1861_v40  ;;  %3241 = vmatpush3.bf16.msra.mxu0 %v3626_v17 }
 0x260   :  { %3307 = vmatpush3.bf16.msra.mxu1 %v3626_v17  ;;  %3242 = vmatprep.subr.bf16.mxu0 %v3627_v18 }
 0x261   :  { %3300 = vmatprep.subr.bf16.mxu1 %v3627_v18 }
 0x263   :  { %3243 = vmatpush3.bf16.msra.mxu0 %v3628_v2 }
 0x264   :  { %3308 = vmatpush3.bf16.msra.mxu1 %v3628_v2  ;;  %3244 = vmatprep.subr.bf16.mxu0 %v3629_v8 }
 0x265   :  { %3301 = vmatprep.subr.bf16.mxu1 %v3629_v8 }
 0x267   :  { %3245 = vmatpush3.bf16.msra.mxu0 %v3630_v9 }
 0x268   :  { %3309 = vmatpush3.bf16.msra.mxu1 %v3630_v9 }
 0x2a7   :  { %v2293_v10 = vpop.f32.mrf.mxu0 }
 0x2a8   :  { %v2294_v22 = vadd.f32 %v2293_v10, %v4203_v45 }
 0x2a9   :  { %v2295_v20 = vpop.f32.mrf.mxu0 }
 0x2aa   :  { %v2296_v54 = vadd.f32 %v2295_v20, %v4200_v31 }
 0x2ab   :  { %v2297_v21 = vpop.f32.mrf.mxu0 }
 0x2ac   :  { %v2298_v55 = vadd.f32 %v2297_v21, %v4203_v45 }
 0x2ad   :  { %v2299_v13 = vpop.f32.mrf.mxu0 }
 0x2ae   :  { %v2300_v49 = vadd.f32 %v2299_v13, %v4200_v31 }
 0x2af   :  { %v2303_v14 = vpop.f32.mrf.mxu0 }
 0x2b0   :  { %v2304_v24 = vadd.f32 %v2303_v14, %v4203_v45 }
 0x2b1   :  { %v2305_v28 = vpop.f32.mrf.mxu0 }
 0x2b2   :  { %v2306_v15 = vadd.f32 %v2305_v28, %v4200_v31 }
 0x2b3   :  { %v2307_v47 = vpop.f32.mrf.mxu0 }
 0x2b4   :  { %v2308_v42 = vadd.f32 %v2307_v47, %v4203_v45 }
 0x2b5   :  { %v2309_v60 = vpop.f32.mrf.mxu0 }
 0x2b6   :  { %v2310_v38 = vadd.f32 %v2309_v60, %v4200_v31 }
 0x2b7   :  { %v2313_v44 = vpop.f32.mrf.mxu0 }
 0x2b8   :  { %v2314_v13 = vadd.f32 %v2313_v44, %v4203_v45 }
 0x2b9   :  { %v2315_v25 = vpop.f32.mrf.mxu0 }
 0x2ba   :  { %v2316_v10 = vadd.f32 %v2315_v25, %v4200_v31 }
 0x2bb   :  { %v2317_v27 = vpop.f32.mrf.mxu0 }
 0x2bc   :  { %v2318_v20 = vadd.f32 %v2317_v27, %v4203_v45 }
 0x2bd   :  { %v2319_v19 = vpop.f32.mrf.mxu0 }
 0x2be   :  { %v2320_v47 = vadd.f32 %v2319_v19, %v4200_v31 }
 0x2bf   :  { %v4186_v43 = vpop.f32.mrf.mxu0 }
 0x2c1   :  { %v4188_v30 = vpop.f32.mrf.mxu0 }
 0x2c2   :  { %v2326_v44 = vadd.f32 %v4188_v30, %v4200_v31 }
 0x2c3   :  { %v4190_v34 = vpop.f32.mrf.mxu0 }
 0x2c4   :  { %v2328_v19 = vadd.f32 %v4190_v34, %v4203_v45 }
 0x2c5   :  { %v4192_v50 = vpop.f32.mrf.mxu0 }
 0x2c7   :  { %v4197_v48 = vpop.f32.mrf.mxu0 }
 0x2c9   :  { %v4205_v52 = vpop.f32.mrf.mxu0 }
 0x2cb   :  { %v4211_v37 = vpop.f32.mrf.mxu0 }
 0x2cd   :  { %v4213_v3 = vpop.f32.mrf.mxu0 }
 0x2cf   :  { %v4219_v46 = vpop.f32.mrf.mxu0 }
 0x2d1   :  { %v4221_v2 = vpop.f32.mrf.mxu0 }
 0x2e7   :  { %v2406_v29 = vpop.f32.mrf.mxu1 }
 0x2e8   :  { %v2407_v12 = vadd.f32 %v2406_v29, %v2294_v22  ;;  %v2347_v29 = vpop.f32.mrf.mxu0 }
 0x2e9   :  { %v2408_v53 = vpop.f32.mrf.mxu1 }
 0x2ea   :  { %v2409_v11 = vadd.f32 %v2408_v53, %v2296_v54  ;;  %v2485_v4 = vmax.f32 %v2407_v12, 0.0  ;;  %v2349_v27 = vpop.f32.mrf.mxu0 }
 0x2eb   :  { %v2410_v57 = vpop.f32.mrf.mxu1 }
 0x2ec   :  { %v2411_v63 = vadd.f32 %v2410_v57, %v2298_v55  ;;  %v2486_v16 = vmax.f32 %v2409_v11, 0.0 }
 0x2ed   :  { %v2412_v56 = vpop.f32.mrf.mxu1 }
 0x2ee   :  { %v2413_v62 = vadd.f32 %v2412_v56, %v2300_v49  ;;  %v2487_v61 = vmax.f32 %v2411_v63, 0.0  ;;  %v2324_v56 = vadd.f32 %v4186_v43, %v4203_v45 }
 0x2ef   :  { %v2416_v59 = vpop.f32.mrf.mxu1 }
 0x2f0   :  { %v2488_v33 = vmax.f32 %v2413_v62, 0.0  ;;  %v2517_v5 = vpack.c.bf16 %v2487_v61, %v2485_v4  ;;  %v2417_v40 = vadd.f32 %v2416_v59, %v2304_v24  ;;  %v2330_v59 = vadd.f32 %v4192_v50, %v4200_v31  ;;  %v2353_v4 = vpop.f32.mrf.mxu0 }
 0x2f1   :  { %v2418_v41 = vpop.f32.mrf.mxu1  ;;  %v2338_v50 = vadd.f32 %v4211_v37, %v4203_v45 }
 0x2f2   :  { %v2518_v23 = vpack.c.bf16 %v2488_v33, %v2486_v16  ;;  %v2419_v6 = vadd.f32 %v2418_v41, %v2306_v15  ;;  %v2489_v8 = vmax.f32 %v2417_v40, 0.0 }
 0x2f3   :  { %v2420_v32 = vpop.f32.mrf.mxu1 }
 0x2f4   :  { %v2421_v7 = vadd.f32 %v2420_v32, %v2308_v42  ;;  %2700 = vmatprep.mubr.bf16.mxu0 %v2518_v23  ;;  %v2490_v17 = vmax.f32 %v2419_v6, 0.0 }
 0x2f5   :  { %v2422_v58 = vpop.f32.mrf.mxu1  ;;  %2701 = vmatmul.mubr.bf16.vlgmr.msra.gmra.mxu0 %v2517_v5  ;;  %v2355_v5 = vpop.f32.mrf.mxu0 }
 0x2f6   :  { %v2423_v1 = vadd.f32 %v2422_v58, %v2310_v38  ;;  %v2491_v26 = vmax.f32 %v2421_v7, 0.0  ;;  %v2336_v38 = vadd.f32 %v4205_v52, %v4200_v31  ;;  %v2334_v7 = vadd.f32 %v4197_v48, %v4203_v45 }
 0x2f7   :  { %v2426_v0 = vpop.f32.mrf.mxu1 }
 0x2f8   :  { %v2492_v18 = vmax.f32 %v2423_v1, 0.0  ;;  %v2519_v14 = vpack.c.bf16 %v2491_v26, %v2489_v8  ;;  %v2427_v53 = vadd.f32 %v2426_v0, %v2314_v13  ;;  %v2340_v1 = vadd.f32 %v4213_v3, %v4200_v31 }
 0x2f9   :  { %v2428_v9 = vpop.f32.mrf.mxu1  ;;  %v2348_v3 = vadd.f32 %v2347_v29, %v4203_v45 }
 0x2fa   :  { %v2520_v21 = vpack.c.bf16 %v2492_v18, %v2490_v17  ;;  %v2429_v60 = vadd.f32 %v2428_v9, %v2316_v10  ;;  %v2493_v11 = vmax.f32 %v2427_v53, 0.0  ;;  %v2357_v17 = vpop.f32.mrf.mxu0  ;;  %v2350_v53 = vadd.f32 %v2349_v27, %v4200_v31 }
 0x2fb   :  { %v2430_v28 = vpop.f32.mrf.mxu1 }
 0x2fc   :  { %v2431_v51 = vadd.f32 %v2430_v28, %v2318_v20  ;;  %2708 = vmatprep.mubr.bf16.mxu0 %v2520_v21  ;;  %v2494_v25 = vmax.f32 %v2429_v60, 0.0  ;;  %v2359_v21 = vpop.f32.mrf.mxu0 }
 0x2fd   :  { %v2432_v54 = vpop.f32.mrf.mxu1  ;;  %2709 = vmatmul.mubr.bf16.gmra.mxu0 %v2519_v14  ;;  %v2346_v14 = vadd.f32 %v4221_v2, %v4200_v31 }
 0x2fe   :  { %v2433_v55 = vadd.f32 %v2432_v54, %v2320_v47  ;;  %v2495_v22 = vmax.f32 %v2431_v51, 0.0  ;;  %v2344_v47 = vadd.f32 %v4219_v46, %v4203_v45  ;;  %v2356_v46 = vadd.f32 %v2355_v5, %v4200_v31 }
 0x2ff   :  { %v2436_v57 = vpop.f32.mrf.mxu1 }
 0x300   :  { %v2496_v49 = vmax.f32 %v2433_v55, 0.0  ;;  %v2521_v62 = vpack.c.bf16 %v2495_v22, %v2493_v11  ;;  %v2437_v41 = vadd.f32 %v2436_v57, %v2324_v56  ;;  %v2363_v22 = vpop.f32.mrf.mxu0  ;;  %v2358_v56 = vadd.f32 %v2357_v17, %v4203_v45 }
 0x301   :  { %v2438_v63 = vpop.f32.mrf.mxu1 }
 0x302   :  { %v2522_v12 = vpack.c.bf16 %v2496_v49, %v2494_v25  ;;  %v2439_v16 = vadd.f32 %v2438_v63, %v2326_v44  ;;  %v2497_v32 = vmax.f32 %v2437_v41, 0.0  ;;  %v2365_v44 = vpop.f32.mrf.mxu0 }
 0x303   :  { %v2440_v61 = vpop.f32.mrf.mxu1 }
 0x304   :  { %v2441_v33 = vadd.f32 %v2440_v61, %v2328_v19  ;;  %2716 = vmatprep.mubr.bf16.mxu0 %v2522_v12  ;;  %v2498_v34 = vmax.f32 %v2439_v16, 0.0  ;;  %v2360_v16 = vadd.f32 %v2359_v21, %v4200_v31 }
 0x305   :  { %v2442_v15 = vpop.f32.mrf.mxu1  ;;  %2717 = vmatmul.mubr.bf16.gmra.mxu0 %v2521_v62  ;;  %v2354_v62 = vadd.f32 %v2353_v4, %v4203_v45  ;;  %v2366_v4 = vadd.f32 %v2365_v44, %v4200_v31 }
 0x306   :  { %v2443_v30 = vadd.f32 %v2442_v15, %v2330_v59  ;;  %v2499_v42 = vmax.f32 %v2441_v33, 0.0  ;;  %v2367_v15 = vpop.f32.mrf.mxu0 }
 0x307   :  { %v2446_v23 = vpop.f32.mrf.mxu1 }
 0x308   :  { %v2500_v24 = vmax.f32 %v2443_v30, 0.0  ;;  %v2523_v40 = vpack.c.bf16 %v2499_v42, %v2497_v32  ;;  %v2447_v18 = vadd.f32 %v2446_v23, %v2334_v7 }
 0x309   :  { %v2448_v43 = vpop.f32.mrf.mxu1 }
 0x30a   :  { %v2524_v6 = vpack.c.bf16 %v2500_v24, %v2498_v34  ;;  %v2449_v26 = vadd.f32 %v2448_v43, %v2336_v38  ;;  %v2501_v13 = vmax.f32 %v2447_v18, 0.0  ;;  %v2369_v43 = vpop.f32.mrf.mxu0 }
 0x30b   :  { %v2450_v58 = vpop.f32.mrf.mxu1 }
 0x30c   :  { %v2451_v0 = vadd.f32 %v2450_v58, %v2338_v50  ;;  %2724 = vmatprep.mubr.bf16.mxu0 %v2524_v6  ;;  %v2502_v37 = vmax.f32 %v2449_v26, 0.0  ;;  %v2368_v6 = vadd.f32 %v2367_v15, %v4203_v45  ;;  %v2370_v26 = vadd.f32 %v2369_v43, %v4200_v31 }
 0x30d   :  { %v2452_v8 = vpop.f32.mrf.mxu1  ;;  %2725 = vmatmul.mubr.bf16.gmra.mxu0 %v2523_v40  ;;  %v2364_v40 = vadd.f32 %v2363_v22, %v4203_v45  ;;  %v2781_v45 = vld [vmem:[%s4376_s9] sm:$0x1] }
 0x30e   :  { %v2453_v52 = vadd.f32 %v2452_v8, %v2340_v1  ;;  %v2503_v9 = vmax.f32 %v2451_v0, 0.0 }
 0x30f   :  { %v2456_v10 = vpop.f32.mrf.mxu1 }
 0x310   :  { %v2504_v20 = vmax.f32 %v2453_v52, 0.0  ;;  %v2525_v60 = vpack.c.bf16 %v2503_v9, %v2501_v13  ;;  %v2457_v57 = vadd.f32 %v2456_v10, %v2344_v47 }
 0x311   :  { %v2458_v48 = vpop.f32.mrf.mxu1 }
 0x312   :  { %v2526_v28 = vpack.c.bf16 %v2504_v20, %v2502_v37  ;;  %v2459_v54 = vadd.f32 %v2458_v48, %v2346_v14  ;;  %v2505_v19 = vmax.f32 %v2457_v57, 0.0  ;;  %v2782_v48 = vunpack.c.l.bf16 %v2781_v45 }
 0x313   :  { %v2460_v51 = vpop.f32.mrf.mxu1 }
 0x314   :  { %v2461_v55 = vadd.f32 %v2460_v51, %v2348_v3  ;;  %2732 = vmatprep.mubr.bf16.mxu1 %v2526_v28  ;;  %v2506_v63 = vmax.f32 %v2459_v54, 0.0  ;;  %v4263_v3 = vld [vmem:[%s4375_s8] ss:$0 sm:$0xff]  ;;  %v4267_v51 = vrot.slane %v2782_v48, %v3887_v39 }
 0x315   :  { %v2462_v25 = vpop.f32.mrf.mxu1  ;;  %2733 = vmatmul.mubr.bf16.vlgmr.msra.gmra.mxu1 %v2525_v60 }
 0x316   :  { %v2463_v49 = vadd.f32 %v2462_v25, %v2350_v53  ;;  %v2507_v11 = vmax.f32 %v2461_v55, 0.0 }
 0x317   :  { %v2466_v2 = vpop.f32.mrf.mxu1 }
 0x318   :  { %v2508_v29 = vmax.f32 %v2463_v49, 0.0  ;;  %v2527_v61 = vpack.c.bf16 %v2507_v11, %v2505_v19  ;;  %v2467_v30 = vadd.f32 %v2466_v2, %v2354_v62 }
 0x319   :  { %v2468_v12 = vpop.f32.mrf.mxu1 }
 0x31a   :  { %v2528_v27 = vpack.c.bf16 %v2508_v29, %v2506_v63  ;;  %v2469_v33 = vadd.f32 %v2468_v12, %v2356_v46  ;;  %v2509_v38 = vmax.f32 %v2467_v30, 0.0 }
 0x31b   :  { %v2470_v59 = vpop.f32.mrf.mxu1 }
 0x31c   :  { %v2471_v41 = vadd.f32 %v2470_v59, %v2358_v56  ;;  %2740 = vmatprep.mubr.bf16.mxu1 %v2528_v27  ;;  %v2510_v5 = vmax.f32 %v2469_v33, 0.0 }
 0x31d   :  { %v2472_v42 = vpop.f32.mrf.mxu1  ;;  %2741 = vmatmul.mubr.bf16.gmra.mxu1 %v2527_v61 }
 0x31e   :  { %v2473_v23 = vadd.f32 %v2472_v42, %v2360_v16  ;;  %v2511_v34 = vmax.f32 %v2471_v41, 0.0 }
 0x31f   :  { %v2476_v24 = vpop.f32.mrf.mxu1 }
 0x320   :  { %v2512_v32 = vmax.f32 %v2473_v23, 0.0  ;;  %v2529_v58 = vpack.c.bf16 %v2511_v34, %v2509_v38  ;;  %v2477_v18 = vadd.f32 %v2476_v24, %v2364_v40 }
 0x321   :  { %v2478_v50 = vpop.f32.mrf.mxu1 }
 0x322   :  { %v2530_v7 = vpack.c.bf16 %v2512_v32, %v2510_v5  ;;  %v2479_v0 = vadd.f32 %v2478_v50, %v2366_v4  ;;  %v2513_v20 = vmax.f32 %v2477_v18, 0.0 }
 0x323   :  { %v2480_v1 = vpop.f32.mrf.mxu1 }
 0x324   :  { %v2481_v17 = vadd.f32 %v2480_v1, %v2368_v6  ;;  %2748 = vmatprep.mubr.bf16.mxu1 %v2530_v7  ;;  %v2514_v10 = vmax.f32 %v2479_v0, 0.0 }
 0x325   :  { %v2482_v8 = vpop.f32.mrf.mxu1  ;;  %2749 = vmatmul.mubr.bf16.gmra.mxu1 %v2529_v58 }
 0x326   :  { %v2483_v52 = vadd.f32 %v2482_v8, %v2370_v26  ;;  %v2515_v9 = vmax.f32 %v2481_v17, 0.0 }
 0x328   :  { %v2516_v37 = vmax.f32 %v2483_v52, 0.0  ;;  %v2531_v13 = vpack.c.bf16 %v2515_v9, %v2513_v20 }
 0x32a   :  { %v2532_v21 = vpack.c.bf16 %v2516_v37, %v2514_v10 }
 0x32c   :  { %2756 = vmatprep.mubr.bf16.mxu1 %v2532_v21 }
 0x32d   :  { %2757 = vmatmul.mubr.bf16.gmra.mxu1 %v2531_v13 }
 0x3b5   :  { %v3246_v31 = vpop.f32.mrf.mxu0 }
 0x3b7   :  { %v3247_v14 = vpop.f32.mrf.mxu0 }
 0x3b8   :  { %v3248_v28 = vadd.f32 %v3247_v14, %v3246_v31 }
 0x3b9   :  { %v3249_v47 = vpop.f32.mrf.mxu0 }
 0x3ba   :  { %v2703_v60 = vadd.f32 %v3248_v28, %v4263_v3 }
 0x3bb   :  { %v3250_v53 = vpop.f32.mrf.mxu0 }
 0x3bc   :  { %v3251_v54 = vadd.f32 %v3250_v53, %v3249_v47  ;;  %v2765_v55 = vmax.f32 %v2703_v60, 0.0 }
 0x3bd   :  { %v3252_v22 = vpop.f32.mrf.mxu0 }
 0x3be   :  { %v2706_v57 = vadd.f32 %v3251_v54, %v4263_v3  ;;  %v2787_v25 = vmul.f32 %v4267_v51, %v2765_v55 }
 0x3bf   :  { %v3253_v49 = vpop.f32.mrf.mxu0 }
 0x3c0   :  { %v2766_v11 = vmax.f32 %v2706_v57, 0.0  ;;  %v3254_v2 = vadd.f32 %v3253_v49, %v3252_v22  ;;  %2803 = vadd.xlane.f32.xlu0 %v2787_v25 }
 0x3c1   :  { %v3255_v63 = vpop.f32.mrf.mxu0 }
 0x3c2   :  { %v2788_v29 = vmul.f32 %v4267_v51, %v2766_v11  ;;  %v2711_v44 = vadd.f32 %v3254_v2, %v4263_v3 }
 0x3c3   :  { %v3256_v19 = vpop.f32.mrf.mxu0 }
 0x3c4   :  { %v3257_v39 = vadd.f32 %v3256_v19, %v3255_v63  ;;  %2805 = vadd.xlane.f32.xlu0 %v2788_v29  ;;  %v2767_v12 = vmax.f32 %v2711_v44, 0.0 }
 0x3c5   :  { %v3258_v46 = vpop.f32.mrf.mxu0 }
 0x3c6   :  { %v2714_v56 = vadd.f32 %v3257_v39, %v4263_v3  ;;  %v2789_v27 = vmul.f32 %v4267_v51, %v2767_v12 }
 0x3c7   :  { %v3259_v62 = vpop.f32.mrf.mxu0 }
 0x3c8   :  { %v2768_v61 = vmax.f32 %v2714_v56, 0.0  ;;  %v3260_v59 = vadd.f32 %v3259_v62, %v3258_v46  ;;  %2807 = vadd.xlane.f32.xlu1 %v2789_v27 }
 0x3c9   :  { %v3261_v16 = vpop.f32.mrf.mxu0 }
 0x3ca   :  { %v2719_v33 = vadd.f32 %v3260_v59, %v4263_v3  ;;  %v2790_v41 = vmul.f32 %v4267_v51, %v2768_v61 }
 0x3cb   :  { %v3262_v15 = vpop.f32.mrf.mxu0 }
 0x3cc   :  { %v2769_v30 = vmax.f32 %v2719_v33, 0.0  ;;  %v3263_v42 = vadd.f32 %v3262_v15, %v3261_v16  ;;  %2809 = vadd.xlane.f32.xlu1 %v2790_v41 }
 0x3cd   :  { %v3264_v23 = vpop.f32.mrf.mxu0 }
 0x3ce   :  { %v2722_v34 = vadd.f32 %v3263_v42, %v4263_v3  ;;  %v2791_v24 = vmul.f32 %v4267_v51, %v2769_v30 }
 0x3cf   :  { %v3265_v5 = vpop.f32.mrf.mxu0 }
 0x3d0   :  { %v2770_v32 = vmax.f32 %v2722_v34, 0.0  ;;  %v3266_v43 = vadd.f32 %v3265_v5, %v3264_v23  ;;  %2811 = vadd.xlane.f32.xlu0 %v2791_v24 }
 0x3d1   :  { %v3267_v38 = vpop.f32.mrf.mxu0 }
 0x3d2   :  { %v2727_v50 = vadd.f32 %v3266_v43, %v4263_v3  ;;  %v2792_v4 = vmul.f32 %v4267_v51, %v2770_v32 }
 0x3d3   :  { %v3268_v6 = vpop.f32.mrf.mxu0 }
 0x3d4   :  { %v2771_v7 = vmax.f32 %v2727_v50, 0.0  ;;  %v3269_v40 = vadd.f32 %v3268_v6, %v3267_v38  ;;  %2813 = vadd.xlane.f32.xlu1 %v2792_v4  ;;  %v4301_v4 = vand.u32 127, %v135_v35 }
 0x3d5   :  { %v3270_v58 = vpop.f32.mrf.mxu1 }
 0x3d6   :  { %v2730_v1 = vadd.f32 %v3269_v40, %v4263_v3  ;;  %v2793_v26 = vmul.f32 %v4267_v51, %v2771_v7  ;;  %v2875_v40 = vadd.s32 4294967288, %v4301_v4 }
 0x3d7   :  { %v3271_v0 = vpop.f32.mrf.mxu1 }
 0x3d8   :  { %v2772_v17 = vmax.f32 %v2730_v1, 0.0  ;;  %v3272_v18 = vadd.f32 %v3271_v0, %v3270_v58  ;;  %2815 = vadd.xlane.f32.xlu0 %v2793_v26  ;;  %v2889_v58 = vadd.s32 4294967272, %v4301_v4  ;;  %v2896_v1 = vadd.s32 4294967264, %v4301_v4 }
 0x3d9   :  { %v3273_v8 = vpop.f32.mrf.mxu1  ;;  %v2903_v0 = vadd.s32 4294967256, %v4301_v4 }
 0x3da   :  { %v2735_v52 = vadd.f32 %v3272_v18, %v4263_v3  ;;  %v2794_v9 = vmul.f32 %v4267_v51, %v2772_v17  ;;  %v2873_v17 = vsub.s32 %v4301_v4, %v3880_v36  ;;  %v2878_v18 = vsub.s32 %v2875_v40, %v3880_v36 }
 0x3db   :  { %v3274_v10 = vpop.f32.mrf.mxu1 }
 0x3dc   :  { %v2773_v37 = vmax.f32 %v2735_v52, 0.0  ;;  %v3275_v20 = vadd.f32 %v3274_v10, %v3273_v8  ;;  %2817 = vadd.xlane.f32.xlu1 %v2794_v9  ;;  %v2910_v8 = vadd.s32 4294967248, %v4301_v4  ;;  %v2917_v9 = vadd.s32 4294967240, %v4301_v4 }
 0x3dd   :  { %v3276_v21 = vpop.f32.mrf.mxu1 }
 0x3de   :  { %v2738_v13 = vadd.f32 %v3275_v20, %v4263_v3  ;;  %v2795_v45 = vmul.f32 %v4267_v51, %v2773_v37  ;;  %v2892_v37 = vsub.s32 %v2889_v58, %v3880_v36  ;;  %v2899_v20 = vsub.s32 %v2896_v1, %v3880_v36 }
 0x3df   :  { %v3277_v31 = vpop.f32.mrf.mxu1 }
 0x3e0   :  { %v2774_v48 = vmax.f32 %v2738_v13, 0.0  ;;  %v3278_v14 = vadd.f32 %v3277_v31, %v3276_v21  ;;  %2819 = vadd.xlane.f32.xlu0 %v2795_v45  ;;  %v2906_v45 = vsub.s32 %v2903_v0, %v3880_v36  ;;  %v2924_v31 = vadd.s32 4294967232, %v4301_v4 }
 0x3e1   :  { %v3279_v28 = vpop.f32.mrf.mxu1 }
 0x3e2   :  { %v2743_v47 = vadd.f32 %v3278_v14, %v4263_v3  ;;  %v2796_v60 = vmul.f32 %v4267_v51, %v2774_v48  ;;  %v2931_v48 = vadd.s32 4294967224, %v4301_v4 }
 0x3e3   :  { %v3280_v53 = vpop.f32.mrf.mxu1 }
 0x3e4   :  { %v2775_v54 = vmax.f32 %v2743_v47, 0.0  ;;  %v3281_v55 = vadd.f32 %v3280_v53, %v3279_v28  ;;  %2821 = vadd.xlane.f32.xlu1 %v2796_v60  ;;  %v2913_v60 = vsub.s32 %v2910_v8, %v3880_v36 }
 0x3e5   :  { %v3282_v22 = vpop.f32.mrf.mxu1 }
 0x3e6   :  { %v2746_v57 = vadd.f32 %v3281_v55, %v4263_v3  ;;  %v2797_v25 = vmul.f32 %v4267_v51, %v2775_v54  ;;  %v2920_v54 = vsub.s32 %v2917_v9, %v3880_v36  ;;  %v2938_v55 = vadd.s32 4294967216, %v4301_v4 }
 0x3e7   :  { %v3283_v49 = vpop.f32.mrf.mxu1 }
 0x3e8   :  { %v2776_v11 = vmax.f32 %v2746_v57, 0.0  ;;  %v3284_v2 = vadd.f32 %v3283_v49, %v3282_v22  ;;  %2823 = vadd.xlane.f32.xlu0 %v2797_v25  ;;  %v2945_v49 = vadd.s32 4294967208, %v4301_v4 }
 0x3e9   :  { %v3285_v63 = vpop.f32.mrf.mxu1 }
 0x3ea   :  { %v2751_v29 = vadd.f32 %v3284_v2, %v4263_v3  ;;  %v2798_v44 = vmul.f32 %v4267_v51, %v2776_v11 }
 0x3eb   :  { %v3286_v19 = vpop.f32.mrf.mxu1 }
 0x3ec   :  { %v2777_v39 = vmax.f32 %v2751_v29, 0.0  ;;  %v3287_v12 = vadd.f32 %v3286_v19, %v3285_v63  ;;  %2825 = vadd.xlane.f32.xlu1 %v2798_v44  ;;  %v2927_v63 = vsub.s32 %v2924_v31, %v3880_v36  ;;  %v2934_v29 = vsub.s32 %v2931_v48, %v3880_v36 }
 0x3ed   :  { %v3288_v46 = vpop.f32.mrf.mxu1 }
 0x3ee   :  { %v2754_v56 = vadd.f32 %v3287_v12, %v4263_v3  ;;  %v2799_v27 = vmul.f32 %v4267_v51, %v2777_v39 }
 0x3ef   :  { %v3289_v62 = vpop.f32.mrf.mxu1 }
 0x3f0   :  { %v2778_v61 = vmax.f32 %v2754_v56, 0.0  ;;  %v3290_v59 = vadd.f32 %v3289_v62, %v3288_v46  ;;  %2827 = vadd.xlane.f32.xlu0 %v2799_v27  ;;  %v2952_v46 = vadd.s32 4294967200, %v4301_v4  ;;  %v2941_v62 = vsub.s32 %v2938_v55, %v3880_v36 }
 0x3f1   :  { %v3291_v16 = vpop.f32.mrf.mxu1 }
 0x3f2   :  { %v2759_v33 = vadd.f32 %v3290_v59, %v4263_v3  ;;  %v2800_v41 = vmul.f32 %v4267_v51, %v2778_v61  ;;  %v2959_v61 = vadd.s32 4294967192, %v4301_v4 }
 0x3f3   :  { %v3292_v15 = vpop.f32.mrf.mxu1 }
 0x3f4   :  { %v2779_v30 = vmax.f32 %v2759_v33, 0.0  ;;  %v3293_v42 = vadd.f32 %v3292_v15, %v3291_v16  ;;  %2829 = vadd.xlane.f32.xlu1 %v2800_v41  ;;  %v2948_v41 = vsub.s32 %v2945_v49, %v3880_v36  ;;  %v2962_v40 = vsub.s32 %v2959_v61, %v3880_v36 }
 0x3f6   :  { %v2762_v23 = vadd.f32 %v3293_v42, %v4263_v3  ;;  %v2801_v34 = vmul.f32 %v4267_v51, %v2779_v30  ;;  %v2882_v3 = vadd.s32 4294967280, %v4301_v4 }
 0x3f8   :  { %v2780_v24 = vmax.f32 %v2762_v23, 0.0  ;;  %2831 = vadd.xlane.f32.xlu0 %v2801_v34  ;;  %v2885_v52 = vsub.s32 %v2882_v3, %v3880_v36 }
 0x3fa   :  { %v2802_v5 = vmul.f32 %v4267_v51, %v2780_v24  ;;  %v4310_v51 = vstv %s4377_s10  ;;  %v2966_v24 = vadd.s32 4294967184, %v4301_v4  ;;  %s3771_s10 = smov [#allocation12]  }
 0x3fb   :  { %s2988_s12 = sshll.u32 %s3771_s10, 4  ;;  %s2989_s12 = int_to_ptr.vmem [resolvable:$true] %s2988_s12 }
 0x3fc   :  { %2833 = vadd.xlane.f32.xlu1 %v2802_v5  ;;  %s3731_s13 = scalar_lea.vmem %s2989_s12, 16  ;;  %s3735_s14 = scalar_lea.vmem %s2989_s12, 32 }
 0x3fd   :  { %p3732_p11 = scmp.ne.s32.totalorder %s2989_s12, %s3731_s13  ;;  %p3736_p12 = scmp.lt.s32.totalorder %s2989_s12, %s2989_s12 }
 0x3fe   :  { %p3737_p13 = scmp.lt.s32.totalorder %s3735_s14, %s3731_s13 }
 0x400   :  { %p3738_p0 = por %p3737_p13, %p3736_p12 }
 0x402   :  { %p3739_p1 = pnand %p3738_p0, %p3732_p11 }
 0x449   :  { %v2804_v32 = vpop.xlane.xlu0 %2803 }
 0x44a   :  { %v2837_v28 = vadd.f32 %v4310_v51, %v2804_v32 }
 0x44c   :  { %v2874_v19 = vrot.slane %v2837_v28, %v2873_v17  ;;  %v2969_v17 = vsub.s32 %v2966_v24, %v3880_v36 }
 0x44d   :  { %v2806_v38 = vpop.xlane.xlu0 %2805 }
 0x44e   :  { %v2838_v10 = vadd.f32 %v4310_v51, %v2806_v38  ;;  %v2955_v38 = vsub.s32 %v2952_v46, %v3880_v36 }
 0x450   :  { %v2879_v22 = vrot.slane %v2838_v10, %v2878_v18 }
 0x451   :  { %v2808_v43 = vpop.xlane.xlu1 %2807 }
 0x452   :  { %v2839_v13 = vadd.f32 %v4310_v51, %v2808_v43  ;;  %v2881_v59 = vsel %vm2880_vm2, %v2879_v22, %v2874_v19 }
 0x454   :  { %v2886_v11 = vrot.slane %v2839_v13, %v2885_v52 }
 0x455   :  { %v2810_v50 = vpop.xlane.xlu1 %2809 }
 0x456   :  { %v2840_v47 = vadd.f32 %v4310_v51, %v2810_v50  ;;  %v2888_v30 = vsel %vm2887_vm3, %v2886_v11, %v2881_v59 }
 0x458   :  { %v2893_v39 = vrot.slane %v2840_v47, %v2892_v37 }
 0x459   :  { %v2812_v6 = vpop.xlane.xlu0 %2811 }
 0x45a   :  { %v2841_v53 = vadd.f32 %v4310_v51, %v2812_v6  ;;  %v2895_v5 = vsel %vm2894_vm4, %v2893_v39, %v2888_v30 }
 0x45c   :  { %v2900_v56 = vrot.slane %v2841_v53, %v2899_v20 }
 0x45d   :  { %v2814_v7 = vpop.xlane.xlu1 %2813 }
 0x45e   :  { %v2842_v57 = vadd.f32 %v4310_v51, %v2814_v7  ;;  %v2902_v50 = vsel %vm2901_vm5, %v2900_v56, %v2895_v5 }
 0x460   :  { %v2907_v16 = vrot.slane %v2842_v57, %v2906_v45 }
 0x461   :  { %v2816_v26 = vpop.xlane.xlu0 %2815 }
 0x462   :  { %v2843_v2 = vadd.f32 %v4310_v51, %v2816_v26  ;;  %v2909_v3 = vsel %vm2908_vm6, %v2907_v16, %v2902_v50  ;;  %v2973_v26 = vadd.s32 4294967176, %v4301_v4 }
 0x464   :  { %v2914_v42 = vrot.slane %v2843_v2, %v2913_v60 }
 0x465   :  { %v2818_v35 = vpop.xlane.xlu1 %2817 }
 0x466   :  { %v2844_v12 = vadd.f32 %v4310_v51, %v2818_v35  ;;  %v2916_v0 = vsel %vm2915_vm7, %v2914_v42, %v2909_v3 }
 0x468   :  { %v2921_v32 = vrot.slane %v2844_v12, %v2920_v54 }
 0x469   :  { %v2820_v21 = vpop.xlane.xlu0 %2819 }
 0x46a   :  { %v2845_v27 = vadd.f32 %v4310_v51, %v2820_v21  ;;  %v2923_v8 = vsel %vm2922_vm8, %v2921_v32, %v2916_v0  ;;  %v2976_v21 = vsub.s32 %v2973_v26, %v3880_v36 }
 0x46c   :  { %v2928_v6 = vrot.slane %v2845_v27, %v2927_v63 }
 0x46d   :  { %v2822_v14 = vpop.xlane.xlu1 %2821 }
 0x46e   :  { %v2846_v33 = vadd.f32 %v4310_v51, %v2822_v14  ;;  %v2930_v10 = vsel %vm2929_vm9, %v2928_v6, %v2923_v8 }
 0x470   :  { %v2935_v58 = vrot.slane %v2846_v33, %v2934_v29 }
 0x471   :  { %v2824_v25 = vpop.xlane.xlu0 %2823 }
 0x472   :  { %v2847_v23 = vadd.f32 %v4310_v51, %v2824_v25  ;;  %v2937_v20 = vsel %vm2936_vm10, %v2935_v58, %v2930_v10 }
 0x474   :  { %v2942_v35 = vrot.slane %v2847_v23, %v2941_v62 }
 0x475   :  { %v2826_v44 = vpop.xlane.xlu1 %2825 }
 0x476   :  { %v2848_v43 = vadd.f32 %v4310_v51, %v2826_v44  ;;  %v2944_v13 = vsel %vm2943_vm11, %v2942_v35, %v2937_v20 }
 0x478   :  { %v2949_v52 = vrot.slane %v2848_v43, %v2948_v41 }
 0x479   :  { %v2828_v15 = vpop.xlane.xlu0 %2827 }
 0x47a   :  { %v2849_v7 = vadd.f32 %v4310_v51, %v2828_v15  ;;  %v2951_v48 = vsel %vm2950_vm12, %v2949_v52, %v2944_v13 }
 0x47c   :  { %v2956_v37 = vrot.slane %v2849_v7, %v2955_v38 }
 0x47d   :  { %v2830_v34 = vpop.xlane.xlu1 %2829 }
 0x47e   :  { %v2850_v1 = vadd.f32 %v4310_v51, %v2830_v34  ;;  %v2958_v28 = vsel %vm2957_vm13, %v2956_v37, %v2951_v48 }
 0x480   :  { %v2963_v4 = vrot.slane %v2850_v1, %v2962_v40 }
 0x481   :  { %v2832_v18 = vpop.xlane.xlu0 %2831 }
 0x482   :  { %v2851_v9 = vadd.f32 %v4310_v51, %v2832_v18  ;;  %v2965_v47 = vsel %vm2964_vm14, %v2963_v4, %v2958_v28 }
 0x484   :  { %v2970_v45 = vrot.slane %v2851_v9, %v2969_v17 }
 0x485   :  { %v2834_v31 = vpop.xlane.xlu1 %2833 }
 0x486   :  { %v2852_v14 = vadd.f32 %v4310_v51, %v2834_v31  ;;  %v2972_v53 = vsel %vm2971_vm15, %v2970_v45, %v2965_v47 }
 0x488   :  { %v2977_v60 = vrot.slane %v2852_v14, %v2976_v21 }
 0x48a   :  { %v2979_v54 = vsel %vm2978_vm0, %v2977_v60, %v2972_v53 }
 0x48b   :  { %2981 = vst [vmem:[#allocation12] sm:$0x1] %v2979_v54 }
 0x48c   :  { %3742 = shalt.err (!%p3739_p1)
}
 0x48d   :  { %2991 = dma.vmem_to_hbm [thread:$0]  %s2989_s12, 16, %s4378_s11, [#allocation5]  }
 0x48e   :  { %3757 = dma.done.wait [#allocation5], 16  }
 0x48f   :  { %3758 = vsyncadd [#allocation5], 4294967280 }
 0x490   :  { %2995 = vsyncpa [#allocation4], 1 }
 0x491   :  { %2996 = vsyncpa [#allocation7], 1 }
 0x492   :  { %2997 = vsyncpa [#allocation10], 1 }
 0x493   :  { %2998 = vsyncpa [#allocation5], 1 }

</bundles_post_ra>
